<compile_context>
chip_gen: v7x
topology: tpu7x:2x2x1
jax: 0.10.0
libtpu: 0.0.40
codegen_flags: <defaults>
</compile_context>

<pallas_src>
import functools
import math

import jax
import jax.numpy as jnp
from jax.experimental import pallas as pl
from jax.experimental.pallas import tpu as pltpu

EXPANSION = 4
BN_EPS = 1e-5
VMEM_LIMIT_BYTES = 32 * 1024 * 1024


# ----------------------------------------------------------------------------
# Small helpers
# ----------------------------------------------------------------------------
def _round_up(a, b):
    return ((a + b - 1) // b) * b


def _pick_divisor(n, candidates):
    for c in candidates:
        if c <= n and n % c == 0:
            return c
    return n


def _pick_row_tile(ho, wo, max_flat=2048):
    """Largest divisor of ho whose flattened (th*wo) block is 8-aligned."""
    cap = min(ho, max(1, max_flat // max(wo, 1)))
    for c in range(cap, 0, -1):
        if ho % c == 0 and (c * wo) % 8 == 0:
            return c
    return ho  # full-extent block is always layout-legal


# ----------------------------------------------------------------------------
# Kernels
# ----------------------------------------------------------------------------
def matmul_bias_kernel(x_ref, w_ref, b_ref, o_ref, *, relu):
    """1x1 conv as matmul (bf16 in, f32 acc) + folded-BN bias (+ ReLU)."""
    y = jnp.dot(x_ref[...].astype(jnp.bfloat16), w_ref[...],
                preferred_element_type=jnp.float32)
    y = y + b_ref[...]
    if relu:
        y = jnp.maximum(y, 0.0)
    o_ref[...] = y.astype(o_ref.dtype)


def matmul_bias_add_relu_kernel(x_ref, w_ref, b_ref, res_ref, o_ref):
    """1x1 conv + folded-BN bias + residual add + ReLU (fused)."""
    y = jnp.dot(x_ref[...].astype(jnp.bfloat16), w_ref[...],
                preferred_element_type=jnp.float32)
    y = y + b_ref[...] + res_ref[...].astype(jnp.float32)
    o_ref[...] = jnp.maximum(y, 0.0).astype(o_ref.dtype)


def conv3x3_bn_relu_kernel(xq_ref, w_ref, b_ref, o_ref, *, stride, th, wo, cin):
    """Strided 3x3 conv + folded-BN bias + ReLU over a phase-decomposed image.

    xq_ref: (Hq, s, Wq, s*Cin)  padded image for one batch element, reshaped so
                                stride phases are explicit (free reshape).
    w_ref : (9, Cin, Cout)      tap t = dy*3 + dx (BN scale pre-folded, bf16).
    o_ref : (th*Wo, Cout)       one tile of th output rows, flattened.
    """
    r = pl.program_id(1)                      # output-row-tile index
    cout = o_ref.shape[-1]
    acc = jnp.zeros((th * wo, cout), jnp.float32)
    for dy in range(3):
        qy, py = divmod(dy, stride)
        for dx in range(3):
            qx, px = divmod(dx, stride)
            patch = xq_ref[pl.ds(r * th + qy, th), py,
                           qx:qx + wo, px * cin:(px + 1) * cin]
            patch = patch.reshape(th * wo, cin).astype(jnp.bfloat16)
            acc = acc + jnp.dot(patch, w_ref[dy * 3 + dx],
                                preferred_element_type=jnp.float32)
    y = acc + b_ref[...]
    o_ref[...] = jnp.maximum(y, 0.0).astype(o_ref.dtype)


# ----------------------------------------------------------------------------
# Wrappers around pallas_call
# ----------------------------------------------------------------------------
def conv1x1_bn(x_nhwc, w_bf16, bias, *, relu, residual=None,
               out_dtype=jnp.bfloat16):
    """1x1 conv (BN scale folded into bf16 weights) + bias (+ReLU / +add-ReLU)."""
    N, H, W, Cin = x_nhwc.shape
    Cout = w_bf16.shape[1]
    M = N * H * W

    tm = _pick_divisor(M, (1024, 512, 256, 128, 64, 32, 16, 8))
    # Keep the double-buffered input block comfortably inside scoped VMEM.
    while tm > 128 and M % (tm // 2) == 0 and tm * Cin * 4 > (4 << 20):
        tm //= 2
    if Cout > 512 and Cout % 128 == 0:
        tn = _pick_divisor(Cout, (512, 256, 128))
    else:
        tn = Cout
    grid = (M // tm, Cout // tn)

    x2d = x_nhwc.reshape(M, Cin)
    b2 = bias.reshape(1, Cout)

    in_specs = [
        pl.BlockSpec((tm, Cin), lambda i, j: (i, 0)),
        pl.BlockSpec((Cin, tn), lambda i, j: (0, j)),
        pl.BlockSpec((1, tn), lambda i, j: (0, j)),
    ]
    args = [x2d, w_bf16, b2]

    if residual is None:
        kernel = functools.partial(matmul_bias_kernel, relu=relu)
    else:
        in_specs.append(pl.BlockSpec((tm, tn), lambda i, j: (i, j)))
        args.append(residual.reshape(M, Cout))
        kernel = matmul_bias_add_relu_kernel

    out2d = pl.pallas_call(
        kernel,
        out_shape=jax.ShapeDtypeStruct((M, Cout), out_dtype),
        grid=grid,
        in_specs=in_specs,
        out_specs=pl.BlockSpec((tm, tn), lambda i, j: (i, j)),
        compiler_params=pltpu.CompilerParams(
            dimension_semantics=("parallel", "parallel"),
            vmem_limit_bytes=VMEM_LIMIT_BYTES),
    )(*args)
    return out2d.reshape(N, H, W, Cout)


def conv3x3_bn_relu(x_nhwc, w9_bf16, bias, stride, *, out_dtype=jnp.bfloat16):
    """Strided 3x3 conv (pad=1) + folded-BN bias + ReLU on NHWC input."""
    assert stride in (1, 2), "ResNet Bottleneck uses stride 1 or 2"
    N, H, W, C = x_nhwc.shape
    Cout = w9_bf16.shape[-1]
    s = stride
    Ho = (H - 1) // s + 1
    Wo = (W - 1) // s + 1

    # Pad so that (a) the usual 1-pixel halo exists and (b) padded dims are
    # multiples of the stride (needed for the free phase reshape below).
    Hp = _round_up(s * (Ho - 1) + 3, s)
    Wp = _round_up(s * (Wo - 1) + 3, s)
    # TODO(synk): write conv1's output directly into this padded buffer (or
    #             mask the halo in-kernel) to remove the extra jnp.pad HBM pass.
    xp = jnp.pad(x_nhwc, ((0, 0), (1, Hp - H - 1), (1, Wp - W - 1), (0, 0)))
    # Free (row-major) phase decomposition: xq[n,qy,py,qx,px*C+c] == xp[n,s*qy+py,s*qx+px,c]
    Hq, Wq = Hp // s, Wp // s
    xq = xp.reshape(N, Hq, s, Wq, s * C)

    w2 = bias.reshape(1, Cout)
    th = _pick_row_tile(Ho, Wo)
    grid = (N, Ho // th)

    out = pl.pallas_call(
        functools.partial(conv3x3_bn_relu_kernel,
                          stride=s, th=th, wo=Wo, cin=C),
        out_shape=jax.ShapeDtypeStruct((N, Ho * Wo, Cout), out_dtype),
        grid=grid,
        in_specs=[
            pl.BlockSpec((None, Hq, s, Wq, s * C), lambda n, r: (n, 0, 0, 0, 0)),
            pl.BlockSpec((9, C, Cout), lambda n, r: (0, 0, 0)),
            pl.BlockSpec((1, Cout), lambda n, r: (0, 0)),
        ],
        out_specs=pl.BlockSpec((None, th * Wo, Cout), lambda n, r: (n, r, 0)),
        compiler_params=pltpu.CompilerParams(
            dimension_semantics=("parallel", "parallel"),
            vmem_limit_bytes=VMEM_LIMIT_BYTES),
    )(xq, w9_bf16, w2)
    return out.reshape(N, Ho, Wo, Cout)


# ----------------------------------------------------------------------------
# Bottleneck forward
# ----------------------------------------------------------------------------
def bottleneck_forward(x_nchw, params, in_planes, planes, stride):
    # TODO(synk): fuse this layout transpose into the first 1x1 conv's reads.
    x = jnp.transpose(x_nchw, (0, 2, 3, 1))  # NCHW -> NHWC (f32)

    # conv1 (1x1) + bn1 + relu  -> bf16 intermediate
    out = conv1x1_bn(x, params["w1"], params["b1"], relu=True)

    # conv2 (3x3, stride, pad=1) + bn2 + relu (true strided conv)
    out = conv3x3_bn_relu(out, params["w2"], params["b2"], stride)

    # shortcut branch
    if stride != 1 or in_planes != EXPANSION * planes:
        # TODO(synk): fetch strided rows via the BlockSpec index_map instead of
        #             materializing the subsampled tensor.
        xs = x[:, ::stride, ::stride, :]
        shortcut = conv1x1_bn(xs, params["wsc"], params["bsc"], relu=False)
    else:
        shortcut = x

    # conv3 (1x1) + bn3 + residual add + relu, fused in one kernel (f32 out)
    out = conv1x1_bn(out, params["w3"], params["b3"], relu=True,
                     residual=shortcut, out_dtype=jnp.float32)

    return jnp.transpose(out, (0, 3, 1, 2))  # NHWC -> NCHW


# ----------------------------------------------------------------------------
# Deterministic parameter init (mirrors nn.Conv2d / nn.BatchNorm2d, eval mode)
# with BN scale folded into bf16 weights.
# ----------------------------------------------------------------------------
def init_params(key, in_planes, planes, stride):
    keys = jax.random.split(key, 8)

    def conv_init(k, shape, fan_in):
        bound = 1.0 / math.sqrt(fan_in)
        return jax.random.uniform(k, shape, jnp.float32, -bound, bound)

    def bn_fold(k, c):
        k1, k2 = jax.random.split(k)
        gamma = jax.random.uniform(k1, (c,), jnp.float32, 0.5, 1.5)
        beta = jax.random.uniform(k2, (c,), jnp.float32, -0.5, 0.5)
        running_mean = jnp.zeros((c,), jnp.float32)
        running_var = jnp.ones((c,), jnp.float32)
        scale = gamma / jnp.sqrt(running_var + BN_EPS)
        bias = beta - running_mean * scale
        return scale, bias

    out_planes = EXPANSION * planes
    w1 = conv_init(keys[0], (in_planes, planes), in_planes)
    w2 = conv_init(keys[1], (3, 3, planes, planes), 9 * planes)
    w3 = conv_init(keys[2], (planes, out_planes), planes)
    s1, b1 = bn_fold(keys[3], planes)
    s2, b2 = bn_fold(keys[4], planes)
    s3, b3 = bn_fold(keys[5], out_planes)

    params = {
        "w1": (w1 * s1[None, :]).astype(jnp.bfloat16), "b1": b1,
        "w2": (w2 * s2[None, None, None, :]).reshape(9, planes, planes)
              .astype(jnp.bfloat16), "b2": b2,
        "w3": (w3 * s3[None, :]).astype(jnp.bfloat16), "b3": b3,
    }
    if stride != 1 or in_planes != out_planes:
        wsc = conv_init(keys[6], (in_planes, out_planes), in_planes)
        ssc, bsc = bn_fold(keys[7], out_planes)
        params["wsc"] = (wsc * ssc[None, :]).astype(jnp.bfloat16)
        params["bsc"] = bsc
    return params


if __name__ == "__main__":
    key = jax.random.PRNGKey(0)
    kx, kp = jax.random.split(key)

    # Small, shape-consistent example: NCHW input like PyTorch.
    N, in_planes, H, W = 2, 16, 16, 16
    planes, stride = 8, 2

    x = jax.random.normal(kx, (N, in_planes, H, W), jnp.float32)
    params = init_params(kp, in_planes, planes, stride)

    fwd = jax.jit(lambda xx, pp: bottleneck_forward(xx, pp, in_planes, planes,
                                                    stride))
    out = fwd(x, params)
    out = jax.block_until_ready(out)

    expected = (N, EXPANSION * planes, H // stride, W // stride)
    assert out.shape == expected, (out.shape, expected)
    assert bool(jnp.all(out >= 0.0))  # final ReLU
    print("KERNEL_OK")
</pallas_src>

<mosaic_0001>
module attributes {stable_mosaic.version = 11 : i64} {
  func.func @matmul_bias_kernel(%arg0: i32, %arg1: i32, %arg2: memref<512x16xf32, #tpu.memory_space<vmem>>, %arg3: memref<16x8xbf16, #tpu.memory_space<vmem>>, %arg4: memref<1x8xf32, #tpu.memory_space<vmem>>, %arg5: memref<512x8xbf16, #tpu.memory_space<vmem>>) attributes {dimension_semantics = [#tpu.dimension_semantics<parallel>, #tpu.dimension_semantics<parallel>], iteration_bounds = array<i64: 1, 1>, scalar_prefetch = 0 : i64, scratch_operands = 0 : i64, tpu.core_type = #tpu.core_type<tc>, window_params = [{transform_indices = @transform_0, window_bounds = array<i64: 512, 16>}, {transform_indices = @transform_1, window_bounds = array<i64: 16, 8>}, {transform_indices = @transform_2, window_bounds = array<i64: 1, 8>}, {transform_indices = @transform_3, window_bounds = array<i64: 512, 8>}]} {
    %c0 = arith.constant 0 : index
    %c0_0 = arith.constant 0 : index
    %0 = vector.load %arg2[%c0, %c0_0] : memref<512x16xf32, #tpu.memory_space<vmem>>, vector<512x16xf32>
    %1 = arith.truncf %0 : vector<512x16xf32> to vector<512x16xbf16>
    %c0_1 = arith.constant 0 : index
    %c0_2 = arith.constant 0 : index
    %2 = vector.load %arg3[%c0_1, %c0_2] : memref<16x8xbf16, #tpu.memory_space<vmem>>, vector<16x8xbf16>
    %cst = arith.constant dense<0.000000e+00> : vector<512x8xf32>
    %3 = tpu.matmul %1, %2, %cst {dimension_numbers = #tpu.dot_dimension_numbers<[1], [0], [0], [1], [0, 0, 1, 1], [], []>} : vector<512x16xbf16>, vector<16x8xbf16>, vector<512x8xf32> -> vector<512x8xf32>
    %c0_3 = arith.constant 0 : index
    %c0_4 = arith.constant 0 : index
    %4 = vector.load %arg4[%c0_3, %c0_4] : memref<1x8xf32, #tpu.memory_space<vmem>>, vector<1x8xf32>
    %5 = vector.broadcast %4 : vector<1x8xf32> to vector<512x8xf32>
    %6 = arith.addf %3, %5 : vector<512x8xf32>
    %cst_5 = arith.constant 0.000000e+00 : f32
    %7 = vector.broadcast %cst_5 : f32 to vector<512x8xf32>
    %8 = arith.maximumf %6, %7 : vector<512x8xf32>
    %9 = arith.truncf %8 : vector<512x8xf32> to vector<512x8xbf16>
    %c0_6 = arith.constant 0 : index
    %c0_7 = arith.constant 0 : index
    %10 = vector.load %arg5[%c0_6, %c0_7] : memref<512x8xbf16, #tpu.memory_space<vmem>>, vector<512x8xbf16>
    tpu.vector_store %arg5[%c0_6, %c0_7], %9 {strides = array<i32>} : memref<512x8xbf16, #tpu.memory_space<vmem>>, vector<512x8xbf16>,
    return
  }
  func.func @transform_0(%arg0: i32, %arg1: i32) -> (i32, i32) {
    %c0_i32 = arith.constant 0 : i32
    %c0_i32_0 = arith.constant 0 : i32
    return %arg0, %c0_i32 : i32, i32
  }
  func.func @transform_1(%arg0: i32, %arg1: i32) -> (i32, i32) {
    %c0_i32 = arith.constant 0 : i32
    %c0_i32_0 = arith.constant 0 : i32
    return %c0_i32, %arg1 : i32, i32
  }
  func.func @transform_2(%arg0: i32, %arg1: i32) -> (i32, i32) {
    %c0_i32 = arith.constant 0 : i32
    %c0_i32_0 = arith.constant 0 : i32
    return %c0_i32, %arg1 : i32, i32
  }
  func.func @transform_3(%arg0: i32, %arg1: i32) -> (i32, i32) {
    %c0_i32 = arith.constant 0 : i32
    return %arg0, %arg1 : i32, i32
  }
}

module attributes {stable_mosaic.version = 11 : i64} {
  func.func @conv3x3_bn_relu_kernel(%arg0: i32, %arg1: i32, %arg2: memref<1x9x2x9x16xbf16, #tpu.memory_space<vmem>>, %arg3: memref<9x8x8xbf16, #tpu.memory_space<vmem>>, %arg4: memref<1x8xf32, #tpu.memory_space<vmem>>, %arg5: memref<1x64x8xbf16, #tpu.memory_space<vmem>>) attributes {dimension_semantics = [#tpu.dimension_semantics<parallel>, #tpu.dimension_semantics<parallel>], iteration_bounds = array<i64: 2, 1>, scalar_prefetch = 0 : i64, scratch_operands = 0 : i64, tpu.core_type = #tpu.core_type<tc>, window_params = [{transform_indices = @transform_0, window_bounds = array<i64: 1, 9, 2, 9, 16>}, {pipeline_mode = #tpu.pipeline_mode<synchronous>, transform_indices = @transform_1, window_bounds = array<i64: 9, 8, 8>}, {pipeline_mode = #tpu.pipeline_mode<synchronous>, transform_indices = @transform_2, window_bounds = array<i64: 1, 8>}, {transform_indices = @transform_3, window_bounds = array<i64: 1, 64, 8>}]} {
    %cst = arith.constant 0.000000e+00 : f32
    %0 = vector.broadcast %cst : f32 to vector<64x8xf32>
    %c8_i32 = arith.constant 8 : i32
    %1 = arith.muli %arg1, %c8_i32 : i32
    %c0_i32 = arith.constant 0 : i32
    %2 = arith.addi %1, %c0_i32 : i32
    %c0 = arith.constant 0 : index
    %3 = arith.index_cast %2 : i32 to index
    %c0_0 = arith.constant 0 : index
    %c0_1 = arith.constant 0 : index
    %c0_2 = arith.constant 0 : index
    %4 = vector.load %arg2[%c0, %3, %c0_0, %c0_1, %c0_2] : memref<1x9x2x9x16xbf16, #tpu.memory_space<vmem>>, vector<1x8x1x8x8xbf16>
    %5 = vector.shape_cast %4 : vector<1x8x1x8x8xbf16> to vector<8x8x8xbf16>
    %6 = vector.shape_cast %5 : vector<8x8x8xbf16> to vector<64x8xbf16>
    %c0_3 = arith.constant 0 : index
    %c0_4 = arith.constant 0 : index
    %c0_5 = arith.constant 0 : index
    %7 = vector.load %arg3[%c0_3, %c0_4, %c0_5] : memref<9x8x8xbf16, #tpu.memory_space<vmem>>, vector<1x8x8xbf16>
    %8 = vector.shape_cast %7 : vector<1x8x8xbf16> to vector<8x8xbf16>
    %cst_6 = arith.constant dense<0.000000e+00> : vector<64x8xf32>
    %9 = tpu.matmul %6, %8, %cst_6 {dimension_numbers = #tpu.dot_dimension_numbers<[1], [0], [0], [1], [0, 0, 1, 1], [], []>} : vector<64x8xbf16>, vector<8x8xbf16>, vector<64x8xf32> -> vector<64x8xf32>
    %10 = arith.addf %0, %9 : vector<64x8xf32>
    %c8_i32_7 = arith.constant 8 : i32
    %11 = arith.muli %arg1, %c8_i32_7 : i32
    %c0_i32_8 = arith.constant 0 : i32
    %12 = arith.addi %11, %c0_i32_8 : i32
    %c0_9 = arith.constant 0 : index
    %13 = arith.index_cast %12 : i32 to index
    %c0_10 = arith.constant 0 : index
    %c0_11 = arith.constant 0 : index
    %c8 = arith.constant 8 : index
    %14 = vector.load %arg2[%c0_9, %13, %c0_10, %c0_11, %c8] : memref<1x9x2x9x16xbf16, #tpu.memory_space<vmem>>, vector<1x8x1x8x8xbf16>
    %15 = vector.shape_cast %14 : vector<1x8x1x8x8xbf16> to vector<8x8x8xbf16>
    %16 = vector.shape_cast %15 : vector<8x8x8xbf16> to vector<64x8xbf16>
    %c1 = arith.constant 1 : index
    %c0_12 = arith.constant 0 : index
    %c0_13 = arith.constant 0 : index
    %17 = vector.load %arg3[%c1, %c0_12, %c0_13] : memref<9x8x8xbf16, #tpu.memory_space<vmem>>, vector<1x8x8xbf16>
    %18 = vector.shape_cast %17 : vector<1x8x8xbf16> to vector<8x8xbf16>
    %cst_14 = arith.constant dense<0.000000e+00> : vector<64x8xf32>
    %19 = tpu.matmul %16, %18, %cst_14 {dimension_numbers = #tpu.dot_dimension_numbers<[1], [0], [0], [1], [0, 0, 1, 1], [], []>} : vector<64x8xbf16>, vector<8x8xbf16>, vector<64x8xf32> -> vector<64x8xf32>
    %20 = arith.addf %10, %19 : vector<64x8xf32>
    %c8_i32_15 = arith.constant 8 : i32
    %21 = arith.muli %arg1, %c8_i32_15 : i32
    %c0_i32_16 = arith.constant 0 : i32
    %22 = arith.addi %21, %c0_i32_16 : i32
    %c0_17 = arith.constant 0 : index
    %23 = arith.index_cast %22 : i32 to index
    %c0_18 = arith.constant 0 : index
    %c1_19 = arith.constant 1 : index
    %c0_20 = arith.constant 0 : index
    %24 = vector.load %arg2[%c0_17, %23, %c0_18, %c1_19, %c0_20] : memref<1x9x2x9x16xbf16, #tpu.memory_space<vmem>>, vector<1x8x1x8x8xbf16>
    %25 = vector.shape_cast %24 : vector<1x8x1x8x8xbf16> to vector<8x8x8xbf16>
    %26 = vector.shape_cast %25 : vector<8x8x8xbf16> to vector<64x8xbf16>
    %c2 = arith.constant 2 : index
    %c0_21 = arith.constant 0 : index
    %c0_22 = arith.constant 0 : index
    %27 = vector.load %arg3[%c2, %c0_21, %c0_22] : memref<9x8x8xbf16, #tpu.memory_space<vmem>>, vector<1x8x8xbf16>
    %28 = vector.shape_cast %27 : vector<1x8x8xbf16> to vector<8x8xbf16>
    %cst_23 = arith.constant dense<0.000000e+00> : vector<64x8xf32>
    %29 = tpu.matmul %26, %28, %cst_23 {dimension_numbers = #tpu.dot_dimension_numbers<[1], [0], [0], [1], [0, 0, 1, 1], [], []>} : vector<64x8xbf16>, vector<8x8xbf16>, vector<64x8xf32> -> vector<64x8xf32>
    %30 = arith.addf %20, %29 : vector<64x8xf32>
    %c8_i32_24 = arith.constant 8 : i32
    %31 = arith.muli %arg1, %c8_i32_24 : i32
    %c0_i32_25 = arith.constant 0 : i32
    %32 = arith.addi %31, %c0_i32_25 : i32
    %c0_26 = arith.constant 0 : index
    %33 = arith.index_cast %32 : i32 to index
    %c1_27 = arith.constant 1 : index
    %c0_28 = arith.constant 0 : index
    %c0_29 = arith.constant 0 : index
    %34 = vector.load %arg2[%c0_26, %33, %c1_27, %c0_28, %c0_29] : memref<1x9x2x9x16xbf16, #tpu.memory_space<vmem>>, vector<1x8x1x8x8xbf16>
    %35 = vector.shape_cast %34 : vector<1x8x1x8x8xbf16> to vector<8x8x8xbf16>
    %36 = vector.shape_cast %35 : vector<8x8x8xbf16> to vector<64x8xbf16>
    %c3 = arith.constant 3 : index
    %c0_30 = arith.constant 0 : index
    %c0_31 = arith.constant 0 : index
    %37 = vector.load %arg3[%c3, %c0_30, %c0_31] : memref<9x8x8xbf16, #tpu.memory_space<vmem>>, vector<1x8x8xbf16>
    %38 = vector.shape_cast %37 : vector<1x8x8xbf16> to vector<8x8xbf16>
    %cst_32 = arith.constant dense<0.000000e+00> : vector<64x8xf32>
    %39 = tpu.matmul %36, %38, %cst_32 {dimension_numbers = #tpu.dot_dimension_numbers<[1], [0], [0], [1], [0, 0, 1, 1], [], []>} : vector<64x8xbf16>, vector<8x8xbf16>, vector<64x8xf32> -> vector<64x8xf32>
    %40 = arith.addf %30, %39 : vector<64x8xf32>
    %c8_i32_33 = arith.constant 8 : i32
    %41 = arith.muli %arg1, %c8_i32_33 : i32
    %c0_i32_34 = arith.constant 0 : i32
    %42 = arith.addi %41, %c0_i32_34 : i32
    %c0_35 = arith.constant 0 : index
    %43 = arith.index_cast %42 : i32 to index
    %c1_36 = arith.constant 1 : index
    %c0_37 = arith.constant 0 : index
    %c8_38 = arith.constant 8 : index
    %44 = vector.load %arg2[%c0_35, %43, %c1_36, %c0_37, %c8_38] : memref<1x9x2x9x16xbf16, #tpu.memory_space<vmem>>, vector<1x8x1x8x8xbf16>
    %45 = vector.shape_cast %44 : vector<1x8x1x8x8xbf16> to vector<8x8x8xbf16>
    %46 = vector.shape_cast %45 : vector<8x8x8xbf16> to vector<64x8xbf16>
    %c4 = arith.constant 4 : index
    %c0_39 = arith.constant 0 : index
    %c0_40 = arith.constant 0 : index
    %47 = vector.load %arg3[%c4, %c0_39, %c0_40] : memref<9x8x8xbf16, #tpu.memory_space<vmem>>, vector<1x8x8xbf16>
    %48 = vector.shape_cast %47 : vector<1x8x8xbf16> to vector<8x8xbf16>
    %cst_41 = arith.constant dense<0.000000e+00> : vector<64x8xf32>
    %49 = tpu.matmul %46, %48, %cst_41 {dimension_numbers = #tpu.dot_dimension_numbers<[1], [0], [0], [1], [0, 0, 1, 1], [], []>} : vector<64x8xbf16>, vector<8x8xbf16>, vector<64x8xf32> -> vector<64x8xf32>
    %50 = arith.addf %40, %49 : vector<64x8xf32>
    %c8_i32_42 = arith.constant 8 : i32
    %51 = arith.muli %arg1, %c8_i32_42 : i32
    %c0_i32_43 = arith.constant 0 : i32
    %52 = arith.addi %51, %c0_i32_43 : i32
    %c0_44 = arith.constant 0 : index
    %53 = arith.index_cast %52 : i32 to index
    %c1_45 = arith.constant 1 : index
    %c1_46 = arith.constant 1 : index
    %c0_47 = arith.constant 0 : index
    %54 = vector.load %arg2[%c0_44, %53, %c1_45, %c1_46, %c0_47] : memref<1x9x2x9x16xbf16, #tpu.memory_space<vmem>>, vector<1x8x1x8x8xbf16>
    %55 = vector.shape_cast %54 : vector<1x8x1x8x8xbf16> to vector<8x8x8xbf16>
    %56 = vector.shape_cast %55 : vector<8x8x8xbf16> to vector<64x8xbf16>
    %c5 = arith.constant 5 : index
    %c0_48 = arith.constant 0 : index
    %c0_49 = arith.constant 0 : index
    %57 = vector.load %arg3[%c5, %c0_48, %c0_49] : memref<9x8x8xbf16, #tpu.memory_space<vmem>>, vector<1x8x8xbf16>
    %58 = vector.shape_cast %57 : vector<1x8x8xbf16> to vector<8x8xbf16>
    %cst_50 = arith.constant dense<0.000000e+00> : vector<64x8xf32>
    %59 = tpu.matmul %56, %58, %cst_50 {dimension_numbers = #tpu.dot_dimension_numbers<[1], [0], [0], [1], [0, 0, 1, 1], [], []>} : vector<64x8xbf16>, vector<8x8xbf16>, vector<64x8xf32> -> vector<64x8xf32>
    %60 = arith.addf %50, %59 : vector<64x8xf32>
    %c8_i32_51 = arith.constant 8 : i32
    %61 = arith.muli %arg1, %c8_i32_51 : i32
    %c1_i32 = arith.constant 1 : i32
    %62 = arith.addi %61, %c1_i32 : i32
    %c0_52 = arith.constant 0 : index
    %63 = arith.index_cast %62 : i32 to index
    %c0_53 = arith.constant 0 : index
    %c0_54 = arith.constant 0 : index
    %c0_55 = arith.constant 0 : index
    %64 = vector.load %arg2[%c0_52, %63, %c0_53, %c0_54, %c0_55] : memref<1x9x2x9x16xbf16, #tpu.memory_space<vmem>>, vector<1x8x1x8x8xbf16>
    %65 = vector.shape_cast %64 : vector<1x8x1x8x8xbf16> to vector<8x8x8xbf16>
    %66 = vector.shape_cast %65 : vector<8x8x8xbf16> to vector<64x8xbf16>
    %c6 = arith.constant 6 : index
    %c0_56 = arith.constant 0 : index
    %c0_57 = arith.constant 0 : index
    %67 = vector.load %arg3[%c6, %c0_56, %c0_57] : memref<9x8x8xbf16, #tpu.memory_space<vmem>>, vector<1x8x8xbf16>
    %68 = vector.shape_cast %67 : vector<1x8x8xbf16> to vector<8x8xbf16>
    %cst_58 = arith.constant dense<0.000000e+00> : vector<64x8xf32>
    %69 = tpu.matmul %66, %68, %cst_58 {dimension_numbers = #tpu.dot_dimension_numbers<[1], [0], [0], [1], [0, 0, 1, 1], [], []>} : vector<64x8xbf16>, vector<8x8xbf16>, vector<64x8xf32> -> vector<64x8xf32>
    %70 = arith.addf %60, %69 : vector<64x8xf32>
    %c8_i32_59 = arith.constant 8 : i32
    %71 = arith.muli %arg1, %c8_i32_59 : i32
    %c1_i32_60 = arith.constant 1 : i32
    %72 = arith.addi %71, %c1_i32_60 : i32
    %c0_61 = arith.constant 0 : index
    %73 = arith.index_cast %72 : i32 to index
    %c0_62 = arith.constant 0 : index
    %c0_63 = arith.constant 0 : index
    %c8_64 = arith.constant 8 : index
    %74 = vector.load %arg2[%c0_61, %73, %c0_62, %c0_63, %c8_64] : memref<1x9x2x9x16xbf16, #tpu.memory_space<vmem>>, vector<1x8x1x8x8xbf16>
    %75 = vector.shape_cast %74 : vector<1x8x1x8x8xbf16> to vector<8x8x8xbf16>
    %76 = vector.shape_cast %75 : vector<8x8x8xbf16> to vector<64x8xbf16>
    %c7 = arith.constant 7 : index
    %c0_65 = arith.constant 0 : index
    %c0_66 = arith.constant 0 : index
    %77 = vector.load %arg3[%c7, %c0_65, %c0_66] : memref<9x8x8xbf16, #tpu.memory_space<vmem>>, vector<1x8x8xbf16>
    %78 = vector.shape_cast %77 : vector<1x8x8xbf16> to vector<8x8xbf16>
    %cst_67 = arith.constant dense<0.000000e+00> : vector<64x8xf32>
    %79 = tpu.matmul %76, %78, %cst_67 {dimension_numbers = #tpu.dot_dimension_numbers<[1], [0], [0], [1], [0, 0, 1, 1], [], []>} : vector<64x8xbf16>, vector<8x8xbf16>, vector<64x8xf32> -> vector<64x8xf32>
    %80 = arith.addf %70, %79 : vector<64x8xf32>
    %c8_i32_68 = arith.constant 8 : i32
    %81 = arith.muli %arg1, %c8_i32_68 : i32
    %c1_i32_69 = arith.constant 1 : i32
    %82 = arith.addi %81, %c1_i32_69 : i32
    %c0_70 = arith.constant 0 : index
    %83 = arith.index_cast %82 : i32 to index
    %c0_71 = arith.constant 0 : index
    %c1_72 = arith.constant 1 : index
    %c0_73 = arith.constant 0 : index
    %84 = vector.load %arg2[%c0_70, %83, %c0_71, %c1_72, %c0_73] : memref<1x9x2x9x16xbf16, #tpu.memory_space<vmem>>, vector<1x8x1x8x8xbf16>
    %85 = vector.shape_cast %84 : vector<1x8x1x8x8xbf16> to vector<8x8x8xbf16>
    %86 = vector.shape_cast %85 : vector<8x8x8xbf16> to vector<64x8xbf16>
    %c8_74 = arith.constant 8 : index
    %c0_75 = arith.constant 0 : index
    %c0_76 = arith.constant 0 : index
    %87 = vector.load %arg3[%c8_74, %c0_75, %c0_76] : memref<9x8x8xbf16, #tpu.memory_space<vmem>>, vector<1x8x8xbf16>
    %88 = vector.shape_cast %87 : vector<1x8x8xbf16> to vector<8x8xbf16>
    %cst_77 = arith.constant dense<0.000000e+00> : vector<64x8xf32>
    %89 = tpu.matmul %86, %88, %cst_77 {dimension_numbers = #tpu.dot_dimension_numbers<[1], [0], [0], [1], [0, 0, 1, 1], [], []>} : vector<64x8xbf16>, vector<8x8xbf16>, vector<64x8xf32> -> vector<64x8xf32>
    %90 = arith.addf %80, %89 : vector<64x8xf32>
    %c0_78 = arith.constant 0 : index
    %c0_79 = arith.constant 0 : index
    %91 = vector.load %arg4[%c0_78, %c0_79] : memref<1x8xf32, #tpu.memory_space<vmem>>, vector<1x8xf32>
    %92 = vector.broadcast %91 : vector<1x8xf32> to vector<64x8xf32>
    %93 = arith.addf %90, %92 : vector<64x8xf32>
    %cst_80 = arith.constant 0.000000e+00 : f32
    %94 = vector.broadcast %cst_80 : f32 to vector<64x8xf32>
    %95 = arith.maximumf %93, %94 : vector<64x8xf32>
    %96 = arith.truncf %95 : vector<64x8xf32> to vector<64x8xbf16>
    %c0_81 = arith.constant 0 : index
    %c0_82 = arith.constant 0 : index
    %c0_83 = arith.constant 0 : index
    %97 = vector.load %arg5[%c0_81, %c0_82, %c0_83] : memref<1x64x8xbf16, #tpu.memory_space<vmem>>, vector<1x64x8xbf16>
    %98 = vector.shape_cast %97 : vector<1x64x8xbf16> to vector<64x8xbf16>
    %99 = vector.shape_cast %96 : vector<64x8xbf16> to vector<1x64x8xbf16>
    tpu.vector_store %arg5[%c0_81, %c0_82, %c0_83], %99 {strides = array<i32>} : memref<1x64x8xbf16, #tpu.memory_space<vmem>>, vector<1x64x8xbf16>,
    return
  }
  func.func @transform_0(%arg0: i32, %arg1: i32) -> (i32, i32, i32, i32, i32) {
    %c0_i32 = arith.constant 0 : i32
    %c0_i32_0 = arith.constant 0 : i32
    %c0_i32_1 = arith.constant 0 : i32
    %c0_i32_2 = arith.constant 0 : i32
    %c0_i32_3 = arith.constant 0 : i32
    return %arg0, %c0_i32, %c0_i32_0, %c0_i32_1, %c0_i32_2 : i32, i32, i32, i32, i32
  }
  func.func @transform_1(%arg0: i32, %arg1: i32) -> (i32, i32, i32) {
    %c0_i32 = arith.constant 0 : i32
    %c0_i32_0 = arith.constant 0 : i32
    %c0_i32_1 = arith.constant 0 : i32
    %c0_i32_2 = arith.constant 0 : i32
    return %c0_i32, %c0_i32_0, %c0_i32_1 : i32, i32, i32
  }
  func.func @transform_2(%arg0: i32, %arg1: i32) -> (i32, i32) {
    %c0_i32 = arith.constant 0 : i32
    %c0_i32_0 = arith.constant 0 : i32
    %c0_i32_1 = arith.constant 0 : i32
    return %c0_i32, %c0_i32_0 : i32, i32
  }
  func.func @transform_3(%arg0: i32, %arg1: i32) -> (i32, i32, i32) {
    %c0_i32 = arith.constant 0 : i32
    %c0_i32_0 = arith.constant 0 : i32
    return %arg0, %arg1, %c0_i32 : i32, i32, i32
  }
}

module attributes {stable_mosaic.version = 11 : i64} {
  func.func @matmul_bias_add_relu_kernel(%arg0: i32, %arg1: i32, %arg2: memref<128x8xbf16, #tpu.memory_space<vmem>>, %arg3: memref<8x32xbf16, #tpu.memory_space<vmem>>, %arg4: memref<1x32xf32, #tpu.memory_space<vmem>>, %arg5: memref<128x32xbf16, #tpu.memory_space<vmem>>, %arg6: memref<128x32xf32, #tpu.memory_space<vmem>>) attributes {dimension_semantics = [#tpu.dimension_semantics<parallel>, #tpu.dimension_semantics<parallel>], iteration_bounds = array<i64: 1, 1>, scalar_prefetch = 0 : i64, scratch_operands = 0 : i64, tpu.core_type = #tpu.core_type<tc>, window_params = [{transform_indices = @transform_0, window_bounds = array<i64: 128, 8>}, {transform_indices = @transform_1, window_bounds = array<i64: 8, 32>}, {transform_indices = @transform_2, window_bounds = array<i64: 1, 32>}, {transform_indices = @transform_3, window_bounds = array<i64: 128, 32>}, {transform_indices = @transform_4, window_bounds = array<i64: 128, 32>}]} {
    %c0 = arith.constant 0 : index
    %c0_0 = arith.constant 0 : index
    %0 = vector.load %arg2[%c0, %c0_0] : memref<128x8xbf16, #tpu.memory_space<vmem>>, vector<128x8xbf16>
    %c0_1 = arith.constant 0 : index
    %c0_2 = arith.constant 0 : index
    %1 = vector.load %arg3[%c0_1, %c0_2] : memref<8x32xbf16, #tpu.memory_space<vmem>>, vector<8x32xbf16>
    %cst = arith.constant dense<0.000000e+00> : vector<128x32xf32>
    %2 = tpu.matmul %0, %1, %cst {dimension_numbers = #tpu.dot_dimension_numbers<[1], [0], [0], [1], [0, 0, 1, 1], [], []>} : vector<128x8xbf16>, vector<8x32xbf16>, vector<128x32xf32> -> vector<128x32xf32>
    %c0_3 = arith.constant 0 : index
    %c0_4 = arith.constant 0 : index
    %3 = vector.load %arg4[%c0_3, %c0_4] : memref<1x32xf32, #tpu.memory_space<vmem>>, vector<1x32xf32>
    %4 = vector.broadcast %3 : vector<1x32xf32> to vector<128x32xf32>
    %5 = arith.addf %2, %4 : vector<128x32xf32>
    %c0_5 = arith.constant 0 : index
    %c0_6 = arith.constant 0 : index
    %6 = vector.load %arg5[%c0_5, %c0_6] : memref<128x32xbf16, #tpu.memory_space<vmem>>, vector<128x32xbf16>
    %7 = arith.extf %6 : vector<128x32xbf16> to vector<128x32xf32>
    %8 = arith.addf %5, %7 : vector<128x32xf32>
    %cst_7 = arith.constant 0.000000e+00 : f32
    %9 = vector.broadcast %cst_7 : f32 to vector<128x32xf32>
    %10 = arith.maximumf %8, %9 : vector<128x32xf32>
    %c0_8 = arith.constant 0 : index
    %c0_9 = arith.constant 0 : index
    %11 = vector.load %arg6[%c0_8, %c0_9] : memref<128x32xf32, #tpu.memory_space<vmem>>, vector<128x32xf32>
    tpu.vector_store %arg6[%c0_8, %c0_9], %10 {strides = array<i32>} : memref<128x32xf32, #tpu.memory_space<vmem>>, vector<128x32xf32>,
    return
  }
  func.func @transform_0(%arg0: i32, %arg1: i32) -> (i32, i32) {
    %c0_i32 = arith.constant 0 : i32
    %c0_i32_0 = arith.constant 0 : i32
    return %arg0, %c0_i32 : i32, i32
  }
  func.func @transform_1(%arg0: i32, %arg1: i32) -> (i32, i32) {
    %c0_i32 = arith.constant 0 : i32
    %c0_i32_0 = arith.constant 0 : i32
    return %c0_i32, %arg1 : i32, i32
  }
  func.func @transform_2(%arg0: i32, %arg1: i32) -> (i32, i32) {
    %c0_i32 = arith.constant 0 : i32
    %c0_i32_0 = arith.constant 0 : i32
    return %c0_i32, %arg1 : i32, i32
  }
  func.func @transform_3(%arg0: i32, %arg1: i32) -> (i32, i32) {
    %c0_i32 = arith.constant 0 : i32
    return %arg0, %arg1 : i32, i32
  }
  func.func @transform_4(%arg0: i32, %arg1: i32) -> (i32, i32) {
    %c0_i32 = arith.constant 0 : i32
    return %arg0, %arg1 : i32, i32
  }
}

module attributes {stable_mosaic.version = 11 : i64} {
  func.func @matmul_bias_kernel(%arg0: i32, %arg1: i32, %arg2: memref<128x16xf32, #tpu.memory_space<vmem>>, %arg3: memref<16x32xbf16, #tpu.memory_space<vmem>>, %arg4: memref<1x32xf32, #tpu.memory_space<vmem>>, %arg5: memref<128x32xbf16, #tpu.memory_space<vmem>>) attributes {dimension_semantics = [#tpu.dimension_semantics<parallel>, #tpu.dimension_semantics<parallel>], iteration_bounds = array<i64: 1, 1>, scalar_prefetch = 0 : i64, scratch_operands = 0 : i64, tpu.core_type = #tpu.core_type<tc>, window_params = [{transform_indices = @transform_0, window_bounds = array<i64: 128, 16>}, {transform_indices = @transform_1, window_bounds = array<i64: 16, 32>}, {transform_indices = @transform_2, window_bounds = array<i64: 1, 32>}, {transform_indices = @transform_3, window_bounds = array<i64: 128, 32>}]} {
    %c0 = arith.constant 0 : index
    %c0_0 = arith.constant 0 : index
    %0 = vector.load %arg2[%c0, %c0_0] : memref<128x16xf32, #tpu.memory_space<vmem>>, vector<128x16xf32>
    %1 = arith.truncf %0 : vector<128x16xf32> to vector<128x16xbf16>
    %c0_1 = arith.constant 0 : index
    %c0_2 = arith.constant 0 : index
    %2 = vector.load %arg3[%c0_1, %c0_2] : memref<16x32xbf16, #tpu.memory_space<vmem>>, vector<16x32xbf16>
    %cst = arith.constant dense<0.000000e+00> : vector<128x32xf32>
    %3 = tpu.matmul %1, %2, %cst {dimension_numbers = #tpu.dot_dimension_numbers<[1], [0], [0], [1], [0, 0, 1, 1], [], []>} : vector<128x16xbf16>, vector<16x32xbf16>, vector<128x32xf32> -> vector<128x32xf32>
    %c0_3 = arith.constant 0 : index
    %c0_4 = arith.constant 0 : index
    %4 = vector.load %arg4[%c0_3, %c0_4] : memref<1x32xf32, #tpu.memory_space<vmem>>, vector<1x32xf32>
    %5 = vector.broadcast %4 : vector<1x32xf32> to vector<128x32xf32>
    %6 = arith.addf %3, %5 : vector<128x32xf32>
    %7 = arith.truncf %6 : vector<128x32xf32> to vector<128x32xbf16>
    %c0_5 = arith.constant 0 : index
    %c0_6 = arith.constant 0 : index
    %8 = vector.load %arg5[%c0_5, %c0_6] : memref<128x32xbf16, #tpu.memory_space<vmem>>, vector<128x32xbf16>
    tpu.vector_store %arg5[%c0_5, %c0_6], %7 {strides = array<i32>} : memref<128x32xbf16, #tpu.memory_space<vmem>>, vector<128x32xbf16>,
    return
  }
  func.func @transform_0(%arg0: i32, %arg1: i32) -> (i32, i32) {
    %c0_i32 = arith.constant 0 : i32
    %c0_i32_0 = arith.constant 0 : i32
    return %arg0, %c0_i32 : i32, i32
  }
  func.func @transform_1(%arg0: i32, %arg1: i32) -> (i32, i32) {
    %c0_i32 = arith.constant 0 : i32
    %c0_i32_0 = arith.constant 0 : i32
    return %c0_i32, %arg1 : i32, i32
  }
  func.func @transform_2(%arg0: i32, %arg1: i32) -> (i32, i32) {
    %c0_i32 = arith.constant 0 : i32
    %c0_i32_0 = arith.constant 0 : i32
    return %c0_i32, %arg1 : i32, i32
  }
  func.func @transform_3(%arg0: i32, %arg1: i32) -> (i32, i32) {
    %c0_i32 = arith.constant 0 : i32
    return %arg0, %arg1 : i32, i32
  }
}

</mosaic_0001>

<bundles_post_ra>
// kernel: _lambda_.4
= control target key start
LH: loop header
LB: loop body
LE: loop exit
PB: predicated region body
PF: predicated region fallthrough
CT: control target
= control target key end

     0   :  { %vm126_vm0 = vcmask 130048   ;;  %vm832_vm1 = vcmask 60416   ;;  %s1737_s1 = inlined_call_operand.vmem [shape: bf16[16,8], index: 1, kind: input, shape index: {}]   ;;  %s1738_s0 = inlined_call_operand.vmem [shape: f32[512,16], index: 0, kind: input, shape index: {}]   ;;  %s1739_s2 = inlined_call_operand.vmem [shape: f32[1,8], index: 2, kind: input, shape index: {}]   ;;  %s1740_s3 = inlined_call_operand.vmem [shape: bf16[512,8], index: 3, kind: output, shape index: {}]  }
   0x1   :  { %v1164_v0 = vld [vmem:[%s1737_s1] sm:$0xff]   ;;  %v16_v2 = vld [vmem:[%s1738_s0 + $0x8] sm:$0xff]  ;;  %v17_v6 = vld [vmem:[%s1738_s0 + $0x10] sm:$0xff] }
   0x2   :  { %v15_v1 = vld [vmem:[%s1738_s0] sm:$0xff]  ;;  %1096 = vmatprep.subr.bf16.mxu0 %v1164_v0  ;;  %1162 = vmatprep.subr.bf16.mxu1 %v1164_v0  ;;  %v48_v5 = vld [vmem:[%s1738_s0 + $0x108] sm:$0xff]  ;;  %v18_v7 = vld [vmem:[%s1738_s0 + $0x18] sm:$0xff] }
   0x3   :  { %v47_v3 = vld [vmem:[%s1738_s0 + $0x100] sm:$0xff]  ;;  %v79_v4 = vpack.c.bf16 %v16_v2, %v15_v1  ;;  %1097 = vmatpush3.bf16.msra.mxu0 %v1164_v0  ;;  %1163 = vmatpush3.bf16.msra.mxu1 %v1164_v0  ;;  %v80_v9 = vpack.c.bf16 %v18_v7, %v17_v6  ;;  %v49_v10 = vld [vmem:[%s1738_s0 + $0x110] sm:$0xff]  ;;  %v50_v11 = vld [vmem:[%s1738_s0 + $0x118] sm:$0xff] }
   0x4   :  { %v95_v8 = vpack.c.bf16 %v48_v5, %v47_v3  ;;  %v19_v12 = vld [vmem:[%s1738_s0 + $0x20] sm:$0xff]  ;;  %v96_v13 = vpack.c.bf16 %v50_v11, %v49_v10  ;;  %v20_v14 = vld [vmem:[%s1738_s0 + $0x28] sm:$0xff]  ;;  %v21_v19 = vld [vmem:[%s1738_s0 + $0x30] sm:$0xff] }
   0x5   :  { %1098 = vmatprep.mubr.msk.bf16.mxu0 %vm126_vm0, %v79_v4  ;;  %v51_v15 = vld [vmem:[%s1738_s0 + $0x120] sm:$0xff]  ;;  %v52_v16 = vld [vmem:[%s1738_s0 + $0x128] sm:$0xff]  ;;  %v81_v17 = vpack.c.bf16 %v20_v14, %v19_v12  ;;  %v22_v20 = vld [vmem:[%s1738_s0 + $0x38] sm:$0xff] }
   0x6   :  { %1130 = vmatprep.mubr.msk.bf16.mxu1 %vm126_vm0, %v95_v8  ;;  %v97_v18 = vpack.c.bf16 %v52_v16, %v51_v15  ;;  %1099 = vmatmul.mubr.msk.bf16.vlgmr.msra.gmra.mrb[0].mxu0 %vm126_vm0, %v80_v9  ;;  %v53_v21 = vld [vmem:[%s1738_s0 + $0x130] sm:$0xff]  ;;  %v54_v22 = vld [vmem:[%s1738_s0 + $0x138] sm:$0xff]  ;;  %v23_v23 = vld [vmem:[%s1738_s0 + $0x40] sm:$0xff]  ;;  %v82_v27 = vpack.c.bf16 %v22_v20, %v21_v19 }
   0x7   :  { %1131 = vmatmul.mubr.msk.bf16.vlgmr.msra.gmra.mrb[0].mxu1 %vm126_vm0, %v96_v13  ;;  %1102 = vmatprep.mubr.msk.bf16.mxu0 %vm126_vm0, %v81_v17  ;;  %v24_v24 = vld [vmem:[%s1738_s0 + $0x48] sm:$0xff]  ;;  %v55_v25 = vld [vmem:[%s1738_s0 + $0x140] sm:$0xff]  ;;  %v98_v28 = vpack.c.bf16 %v54_v22, %v53_v21  ;;  %v25_v31 = vld [vmem:[%s1738_s0 + $0x50] sm:$0xff] }
   0x8   :  { %1134 = vmatprep.mubr.msk.bf16.mxu1 %vm126_vm0, %v97_v18  ;;  %v56_v26 = vld [vmem:[%s1738_s0 + $0x148] sm:$0xff]  ;;  %v83_v29 = vpack.c.bf16 %v24_v24, %v23_v23  ;;  %v26_v32 = vld [vmem:[%s1738_s0 + $0x58] sm:$0xff]  ;;  %v57_v33 = vld [vmem:[%s1738_s0 + $0x150] sm:$0xff] }
   0x9   :  { %v99_v30 = vpack.c.bf16 %v56_v26, %v55_v25  ;;  %v58_v34 = vld [vmem:[%s1738_s0 + $0x158] sm:$0xff]  ;;  %v27_v35 = vld [vmem:[%s1738_s0 + $0x60] sm:$0xff]  ;;  %v28_v36 = vld [vmem:[%s1738_s0 + $0x68] sm:$0xff]  ;;  %v84_v39 = vpack.c.bf16 %v26_v32, %v25_v31 }
   0xa   :  { %v59_v37 = vld [vmem:[%s1738_s0 + $0x160] sm:$0xff]  ;;  %v60_v38 = vld [vmem:[%s1738_s0 + $0x168] sm:$0xff]  ;;  %v100_v40 = vpack.c.bf16 %v58_v34, %v57_v33  ;;  %v85_v41 = vpack.c.bf16 %v28_v36, %v27_v35  ;;  %v29_v43 = vld [vmem:[%s1738_s0 + $0x70] sm:$0xff] }
   0xb   :  { %v101_v42 = vpack.c.bf16 %v60_v38, %v59_v37  ;;  %v30_v44 = vld [vmem:[%s1738_s0 + $0x78] sm:$0xff]  ;;  %v61_v45 = vld [vmem:[%s1738_s0 + $0x170] sm:$0xff]  ;;  %v31_v47 = vld [vmem:[%s1738_s0 + $0x80] sm:$0xff] }
   0xc   :  { %v62_v46 = vld [vmem:[%s1738_s0 + $0x178] sm:$0xff]  ;;  %v32_v48 = vld [vmem:[%s1738_s0 + $0x88] sm:$0xff]  ;;  %v63_v49 = vld [vmem:[%s1738_s0 + $0x180] sm:$0xff]  ;;  %v86_v51 = vpack.c.bf16 %v30_v44, %v29_v43 }
   0xd   :  { %v64_v50 = vld [vmem:[%s1738_s0 + $0x188] sm:$0xff]  ;;  %v102_v52 = vpack.c.bf16 %v62_v46, %v61_v45  ;;  %v87_v53 = vpack.c.bf16 %v32_v48, %v31_v47  ;;  %v33_v55 = vld [vmem:[%s1738_s0 + $0x90] sm:$0xff]  ;;  %v34_v56 = vld [vmem:[%s1738_s0 + $0x98] sm:$0xff] }
   0xe   :  { %1103 = vmatmul.mubr.msk.bf16.gmra.mrb[4].mxu0 %vm126_vm0, %v82_v27  ;;  %v103_v54 = vpack.c.bf16 %v64_v50, %v63_v49  ;;  %v65_v57 = vld [vmem:[%s1738_s0 + $0x190] sm:$0xff]  ;;  %v66_v58 = vld [vmem:[%s1738_s0 + $0x198] sm:$0xff]  ;;  %v35_v59 = vld [vmem:[%s1738_s0 + $0xa0] sm:$0xff]  ;;  %v88_v63 = vpack.c.bf16 %v34_v56, %v33_v55 }
   0xf   :  { %1135 = vmatmul.mubr.msk.bf16.gmra.mrb[4].mxu1 %vm126_vm0, %v98_v28  ;;  %1106 = vmatprep.mubr.msk.bf16.mxu0 %vm126_vm0, %v83_v29  ;;  %v36_v60 = vld [vmem:[%s1738_s0 + $0xa8] sm:$0xff]  ;;  %v67_v61 = vld [vmem:[%s1738_s0 + $0x1a0] sm:$0xff]  ;;  %v104_v0 = vpack.c.bf16 %v66_v58, %v65_v57  ;;  %v37_v3 = vld [vmem:[%s1738_s0 + $0xb0] sm:$0xff] }
  0x10   :  { %1138 = vmatprep.mubr.msk.bf16.mxu1 %vm126_vm0, %v99_v30  ;;  %v68_v62 = vld [vmem:[%s1738_s0 + $0x1a8] sm:$0xff]  ;;  %v89_v1 = vpack.c.bf16 %v36_v60, %v35_v59  ;;  %v38_v4 = vld [vmem:[%s1738_s0 + $0xb8] sm:$0xff]  ;;  %v69_v5 = vld [vmem:[%s1738_s0 + $0x1b0] sm:$0xff] }
  0x11   :  { %v105_v2 = vpack.c.bf16 %v68_v62, %v67_v61  ;;  %v70_v6 = vld [vmem:[%s1738_s0 + $0x1b8] sm:$0xff]  ;;  %v39_v7 = vld [vmem:[%s1738_s0 + $0xc0] sm:$0xff]  ;;  %v40_v8 = vld [vmem:[%s1738_s0 + $0xc8] sm:$0xff]  ;;  %v90_v11 = vpack.c.bf16 %v38_v4, %v37_v3 }
  0x12   :  { %v71_v9 = vld [vmem:[%s1738_s0 + $0x1c0] sm:$0xff]  ;;  %v72_v10 = vld [vmem:[%s1738_s0 + $0x1c8] sm:$0xff]  ;;  %v106_v12 = vpack.c.bf16 %v70_v6, %v69_v5  ;;  %v91_v13 = vpack.c.bf16 %v40_v8, %v39_v7  ;;  %v41_v15 = vld [vmem:[%s1738_s0 + $0xd0] sm:$0xff] }
  0x13   :  { %v107_v14 = vpack.c.bf16 %v72_v10, %v71_v9  ;;  %v42_v16 = vld [vmem:[%s1738_s0 + $0xd8] sm:$0xff]  ;;  %v73_v17 = vld [vmem:[%s1738_s0 + $0x1d0] sm:$0xff]  ;;  %v43_v19 = vld [vmem:[%s1738_s0 + $0xe0] sm:$0xff] }
  0x14   :  { %v74_v18 = vld [vmem:[%s1738_s0 + $0x1d8] sm:$0xff]  ;;  %v44_v20 = vld [vmem:[%s1738_s0 + $0xe8] sm:$0xff]  ;;  %v75_v21 = vld [vmem:[%s1738_s0 + $0x1e0] sm:$0xff]  ;;  %v92_v23 = vpack.c.bf16 %v42_v16, %v41_v15 }
  0x15   :  { %v76_v22 = vld [vmem:[%s1738_s0 + $0x1e8] sm:$0xff]  ;;  %v108_v24 = vpack.c.bf16 %v74_v18, %v73_v17  ;;  %v93_v25 = vpack.c.bf16 %v44_v20, %v43_v19  ;;  %v45_v27 = vld [vmem:[%s1738_s0 + $0xf0] sm:$0xff]  ;;  %v46_v28 = vld [vmem:[%s1738_s0 + $0xf8] sm:$0xff] }
  0x16   :  { %1107 = vmatmul.mubr.msk.bf16.gmra.mrb[8].mxu0 %vm126_vm0, %v84_v39  ;;  %v109_v26 = vpack.c.bf16 %v76_v22, %v75_v21  ;;  %v77_v29 = vld [vmem:[%s1738_s0 + $0x1f0] sm:$0xff]  ;;  %v78_v30 = vld [vmem:[%s1738_s0 + $0x1f8] sm:$0xff]  ;;  %v94_v31 = vpack.c.bf16 %v46_v28, %v45_v27  ;;  %v1415_v33 = vld [vmem:[%s1739_s2] ss:$0 sm:$0xff] }
  0x17   :  { %1139 = vmatmul.mubr.msk.bf16.gmra.mrb[8].mxu1 %vm126_vm0, %v100_v40  ;;  %1110 = vmatprep.mubr.msk.bf16.mxu0 %vm126_vm0, %v85_v41  ;;  %v110_v32 = vpack.c.bf16 %v78_v30, %v77_v29 }
  0x18   :  { %1142 = vmatprep.mubr.msk.bf16.mxu1 %vm126_vm0, %v101_v42 }
  0x1e   :  { %1111 = vmatmul.mubr.msk.bf16.gmra.mrb[12].mxu0 %vm126_vm0, %v86_v51 }
  0x1f   :  { %1143 = vmatmul.mubr.msk.bf16.gmra.mrb[12].mxu1 %vm126_vm0, %v102_v52  ;;  %1114 = vmatprep.mubr.msk.bf16.mxu0 %vm126_vm0, %v87_v53 }
  0x20   :  { %1146 = vmatprep.mubr.msk.bf16.mxu1 %vm126_vm0, %v103_v54 }
  0x26   :  { %1115 = vmatmul.mubr.msk.bf16.gmra.mrb[16].mxu0 %vm126_vm0, %v88_v63 }
  0x27   :  { %1147 = vmatmul.mubr.msk.bf16.gmra.mrb[16].mxu1 %vm126_vm0, %v104_v0  ;;  %1118 = vmatprep.mubr.msk.bf16.mxu0 %vm126_vm0, %v89_v1 }
  0x28   :  { %1150 = vmatprep.mubr.msk.bf16.mxu1 %vm126_vm0, %v105_v2 }
  0x2e   :  { %1119 = vmatmul.mubr.msk.bf16.gmra.mrb[20].mxu0 %vm126_vm0, %v90_v11 }
  0x2f   :  { %1151 = vmatmul.mubr.msk.bf16.gmra.mrb[20].mxu1 %vm126_vm0, %v106_v12  ;;  %1122 = vmatprep.mubr.msk.bf16.mxu0 %vm126_vm0, %v91_v13 }
  0x30   :  { %1154 = vmatprep.mubr.msk.bf16.mxu1 %vm126_vm0, %v107_v14 }
  0x36   :  { %1123 = vmatmul.mubr.msk.bf16.gmra.mrb[24].mxu0 %vm126_vm0, %v92_v23 }
  0x37   :  { %1155 = vmatmul.mubr.msk.bf16.gmra.mrb[24].mxu1 %vm126_vm0, %v108_v24  ;;  %1126 = vmatprep.mubr.msk.bf16.mxu0 %vm126_vm0, %v93_v25 }
  0x38   :  { %1158 = vmatprep.mubr.msk.bf16.mxu1 %vm126_vm0, %v109_v26 }
  0x3e   :  { %1127 = vmatmul.mubr.msk.bf16.gmra.mrb[28].mxu0 %vm126_vm0, %v94_v31 }
  0x3f   :  { %1159 = vmatmul.mubr.msk.bf16.gmra.mrb[28].mxu1 %vm126_vm0, %v110_v32 }
  0xd9   :  { %v1100_v34 = vpop.f32.mrb[0].mxu0 }
  0xda   :  { %v1132_v35 = vpop.f32.mrb[0].mxu1  ;;  %v266_v36 = vadd.f32 %v1100_v34, %v1415_v33  ;;  %v257_v38 = vpop.f32.mrb[1].mxu0 }
  0xdb   :  { %v394_v37 = vadd.f32 %v1132_v35, %v1415_v33  ;;  %v385_v39 = vpop.f32.mrb[1].mxu1  ;;  %v258_v40 = vadd.f32 %v1415_v33, %v257_v38  ;;  %v1101_v42 = vpop.f32.mrb[2].mxu0 }
  0xdc   :  { %v386_v41 = vadd.f32 %v1415_v33, %v385_v39  ;;  %v1133_v43 = vpop.f32.mrb[2].mxu1  ;;  %v514_v44 = vmax.f32 %v266_v36, 0.0  ;;  %v269_v46 = vadd.f32 %v1101_v42, %v1415_v33  ;;  %v260_v48 = vpop.f32.mrb[3].mxu0 }
  0xdd   :  { %v546_v45 = vmax.f32 %v394_v37, 0.0  ;;  %v397_v47 = vadd.f32 %v1133_v43, %v1415_v33  ;;  %v388_v49 = vpop.f32.mrb[3].mxu1  ;;  %v512_v50 = vmax.f32 %v258_v40, 0.0  ;;  %v261_v52 = vadd.f32 %v1415_v33, %v260_v48 }
  0xde   :  { %v544_v51 = vmax.f32 %v386_v41, 0.0  ;;  %v389_v53 = vadd.f32 %v1415_v33, %v388_v49  ;;  %v1001_v54 = vpack.c.bf16 %v514_v44, %v514_v44  ;;  %v515_v56 = vmax.f32 %v269_v46, 0.0 }
  0xdf   :  { %v1033_v55 = vpack.c.bf16 %v546_v45, %v546_v45  ;;  %v547_v57 = vmax.f32 %v397_v47, 0.0  ;;  %v999_v58 = vpack.c.bf16 %v512_v50, %v512_v50  ;;  %v513_v60 = vmax.f32 %v261_v52, 0.0 }
  0xe0   :  { %v1031_v59 = vpack.c.bf16 %v544_v51, %v544_v51  ;;  %v545_v61 = vmax.f32 %v389_v53, 0.0  ;;  %835 = vst.msk [vmem:[%s1740_s3 + $0x8] sm:$0xf] %vm832_vm1, %v1001_v54  ;;  %v1002_v62 = vpack.c.bf16 %v515_v56, %v515_v56 }
  0xe1   :  { %867 = vst.msk [vmem:[%s1740_s3 + $0x88] sm:$0xf] %vm832_vm1, %v1033_v55  ;;  %v1034_v63 = vpack.c.bf16 %v547_v57, %v547_v57  ;;  %833 = vst.msk [vmem:[%s1740_s3] sm:$0xf] %vm832_vm1, %v999_v58  ;;  %v1000_v0 = vpack.c.bf16 %v513_v60, %v513_v60  ;;  %v1104_v2 = vpop.f32.mrb[4].mxu0 }
  0xe2   :  { %865 = vst.msk [vmem:[%s1740_s3 + $0x80] sm:$0xf] %vm832_vm1, %v1031_v59  ;;  %v1032_v1 = vpack.c.bf16 %v545_v61, %v545_v61  ;;  %v1136_v3 = vpop.f32.mrb[4].mxu1  ;;  %836 = vst.msk [vmem:[%s1740_s3 + $0xc] sm:$0xf] %vm832_vm1, %v1002_v62  ;;  %v282_v4 = vadd.f32 %v1104_v2, %v1415_v33  ;;  %v273_v6 = vpop.f32.mrb[5].mxu0 }
  0xe3   :  { %868 = vst.msk [vmem:[%s1740_s3 + $0x8c] sm:$0xf] %vm832_vm1, %v1034_v63  ;;  %v410_v5 = vadd.f32 %v1136_v3, %v1415_v33  ;;  %v401_v7 = vpop.f32.mrb[5].mxu1  ;;  %834 = vst.msk [vmem:[%s1740_s3 + $0x4] sm:$0xf] %vm832_vm1, %v1000_v0  ;;  %v274_v8 = vadd.f32 %v1415_v33, %v273_v6  ;;  %v1105_v10 = vpop.f32.mrb[6].mxu0 }
  0xe4   :  { %866 = vst.msk [vmem:[%s1740_s3 + $0x84] sm:$0xf] %vm832_vm1, %v1032_v1  ;;  %v402_v9 = vadd.f32 %v1415_v33, %v401_v7  ;;  %v1137_v11 = vpop.f32.mrb[6].mxu1  ;;  %v518_v12 = vmax.f32 %v282_v4, 0.0  ;;  %v285_v14 = vadd.f32 %v1105_v10, %v1415_v33  ;;  %v276_v16 = vpop.f32.mrb[7].mxu0 }
  0xe5   :  { %v550_v13 = vmax.f32 %v410_v5, 0.0  ;;  %v413_v15 = vadd.f32 %v1137_v11, %v1415_v33  ;;  %v404_v17 = vpop.f32.mrb[7].mxu1  ;;  %v516_v18 = vmax.f32 %v274_v8, 0.0  ;;  %v277_v20 = vadd.f32 %v1415_v33, %v276_v16 }
  0xe6   :  { %v548_v19 = vmax.f32 %v402_v9, 0.0  ;;  %v405_v21 = vadd.f32 %v1415_v33, %v404_v17  ;;  %v1005_v22 = vpack.c.bf16 %v518_v12, %v518_v12  ;;  %v519_v24 = vmax.f32 %v285_v14, 0.0 }
  0xe7   :  { %v1037_v23 = vpack.c.bf16 %v550_v13, %v550_v13  ;;  %v551_v25 = vmax.f32 %v413_v15, 0.0  ;;  %v1003_v26 = vpack.c.bf16 %v516_v18, %v516_v18  ;;  %v517_v28 = vmax.f32 %v277_v20, 0.0 }
  0xe8   :  { %v1035_v27 = vpack.c.bf16 %v548_v19, %v548_v19  ;;  %v549_v29 = vmax.f32 %v405_v21, 0.0  ;;  %839 = vst.msk [vmem:[%s1740_s3 + $0x18] sm:$0xf] %vm832_vm1, %v1005_v22  ;;  %v1006_v30 = vpack.c.bf16 %v519_v24, %v519_v24 }
  0xe9   :  { %871 = vst.msk [vmem:[%s1740_s3 + $0x98] sm:$0xf] %vm832_vm1, %v1037_v23  ;;  %v1038_v31 = vpack.c.bf16 %v551_v25, %v551_v25  ;;  %837 = vst.msk [vmem:[%s1740_s3 + $0x10] sm:$0xf] %vm832_vm1, %v1003_v26  ;;  %v1004_v32 = vpack.c.bf16 %v517_v28, %v517_v28  ;;  %v1108_v35 = vpop.f32.mrb[8].mxu0 }
  0xea   :  { %869 = vst.msk [vmem:[%s1740_s3 + $0x90] sm:$0xf] %vm832_vm1, %v1035_v27  ;;  %v1036_v34 = vpack.c.bf16 %v549_v29, %v549_v29  ;;  %v1140_v36 = vpop.f32.mrb[8].mxu1  ;;  %840 = vst.msk [vmem:[%s1740_s3 + $0x1c] sm:$0xf] %vm832_vm1, %v1006_v30  ;;  %v298_v37 = vadd.f32 %v1108_v35, %v1415_v33  ;;  %v289_v39 = vpop.f32.mrb[9].mxu0 }
  0xeb   :  { %872 = vst.msk [vmem:[%s1740_s3 + $0x9c] sm:$0xf] %vm832_vm1, %v1038_v31  ;;  %v426_v38 = vadd.f32 %v1140_v36, %v1415_v33  ;;  %v417_v40 = vpop.f32.mrb[9].mxu1  ;;  %838 = vst.msk [vmem:[%s1740_s3 + $0x14] sm:$0xf] %vm832_vm1, %v1004_v32  ;;  %v290_v41 = vadd.f32 %v1415_v33, %v289_v39  ;;  %v1109_v43 = vpop.f32.mrb[10].mxu0 }
  0xec   :  { %870 = vst.msk [vmem:[%s1740_s3 + $0x94] sm:$0xf] %vm832_vm1, %v1036_v34  ;;  %v418_v42 = vadd.f32 %v1415_v33, %v417_v40  ;;  %v1141_v44 = vpop.f32.mrb[10].mxu1  ;;  %v522_v45 = vmax.f32 %v298_v37, 0.0  ;;  %v301_v47 = vadd.f32 %v1109_v43, %v1415_v33  ;;  %v292_v49 = vpop.f32.mrb[11].mxu0 }
  0xed   :  { %v554_v46 = vmax.f32 %v426_v38, 0.0  ;;  %v429_v48 = vadd.f32 %v1141_v44, %v1415_v33  ;;  %v420_v50 = vpop.f32.mrb[11].mxu1  ;;  %v520_v51 = vmax.f32 %v290_v41, 0.0  ;;  %v293_v53 = vadd.f32 %v1415_v33, %v292_v49 }
  0xee   :  { %v552_v52 = vmax.f32 %v418_v42, 0.0  ;;  %v421_v54 = vadd.f32 %v1415_v33, %v420_v50  ;;  %v1009_v55 = vpack.c.bf16 %v522_v45, %v522_v45  ;;  %v523_v57 = vmax.f32 %v301_v47, 0.0 }
  0xef   :  { %v1041_v56 = vpack.c.bf16 %v554_v46, %v554_v46  ;;  %v555_v58 = vmax.f32 %v429_v48, 0.0  ;;  %v1007_v59 = vpack.c.bf16 %v520_v51, %v520_v51  ;;  %v521_v61 = vmax.f32 %v293_v53, 0.0 }
  0xf0   :  { %v1039_v60 = vpack.c.bf16 %v552_v52, %v552_v52  ;;  %v553_v62 = vmax.f32 %v421_v54, 0.0  ;;  %843 = vst.msk [vmem:[%s1740_s3 + $0x28] sm:$0xf] %vm832_vm1, %v1009_v55  ;;  %v1010_v63 = vpack.c.bf16 %v523_v57, %v523_v57 }
  0xf1   :  { %875 = vst.msk [vmem:[%s1740_s3 + $0xa8] sm:$0xf] %vm832_vm1, %v1041_v56  ;;  %v1042_v0 = vpack.c.bf16 %v555_v58, %v555_v58  ;;  %841 = vst.msk [vmem:[%s1740_s3 + $0x20] sm:$0xf] %vm832_vm1, %v1007_v59  ;;  %v1008_v1 = vpack.c.bf16 %v521_v61, %v521_v61  ;;  %v1112_v3 = vpop.f32.mrb[12].mxu0 }
  0xf2   :  { %873 = vst.msk [vmem:[%s1740_s3 + $0xa0] sm:$0xf] %vm832_vm1, %v1039_v60  ;;  %v1040_v2 = vpack.c.bf16 %v553_v62, %v553_v62  ;;  %v1144_v4 = vpop.f32.mrb[12].mxu1  ;;  %844 = vst.msk [vmem:[%s1740_s3 + $0x2c] sm:$0xf] %vm832_vm1, %v1010_v63  ;;  %v314_v5 = vadd.f32 %v1112_v3, %v1415_v33  ;;  %v305_v7 = vpop.f32.mrb[13].mxu0 }
  0xf3   :  { %876 = vst.msk [vmem:[%s1740_s3 + $0xac] sm:$0xf] %vm832_vm1, %v1042_v0  ;;  %v442_v6 = vadd.f32 %v1144_v4, %v1415_v33  ;;  %v433_v8 = vpop.f32.mrb[13].mxu1  ;;  %842 = vst.msk [vmem:[%s1740_s3 + $0x24] sm:$0xf] %vm832_vm1, %v1008_v1  ;;  %v306_v9 = vadd.f32 %v1415_v33, %v305_v7  ;;  %v1113_v11 = vpop.f32.mrb[14].mxu0 }
  0xf4   :  { %874 = vst.msk [vmem:[%s1740_s3 + $0xa4] sm:$0xf] %vm832_vm1, %v1040_v2  ;;  %v434_v10 = vadd.f32 %v1415_v33, %v433_v8  ;;  %v1145_v12 = vpop.f32.mrb[14].mxu1  ;;  %v526_v13 = vmax.f32 %v314_v5, 0.0  ;;  %v317_v15 = vadd.f32 %v1113_v11, %v1415_v33  ;;  %v308_v17 = vpop.f32.mrb[15].mxu0 }
  0xf5   :  { %v558_v14 = vmax.f32 %v442_v6, 0.0  ;;  %v445_v16 = vadd.f32 %v1145_v12, %v1415_v33  ;;  %v436_v18 = vpop.f32.mrb[15].mxu1  ;;  %v524_v19 = vmax.f32 %v306_v9, 0.0  ;;  %v309_v21 = vadd.f32 %v1415_v33, %v308_v17 }
  0xf6   :  { %v556_v20 = vmax.f32 %v434_v10, 0.0  ;;  %v437_v22 = vadd.f32 %v1415_v33, %v436_v18  ;;  %v1013_v23 = vpack.c.bf16 %v526_v13, %v526_v13  ;;  %v527_v25 = vmax.f32 %v317_v15, 0.0 }
  0xf7   :  { %v1045_v24 = vpack.c.bf16 %v558_v14, %v558_v14  ;;  %v559_v26 = vmax.f32 %v445_v16, 0.0  ;;  %v1011_v27 = vpack.c.bf16 %v524_v19, %v524_v19  ;;  %v525_v29 = vmax.f32 %v309_v21, 0.0 }
  0xf8   :  { %v1043_v28 = vpack.c.bf16 %v556_v20, %v556_v20  ;;  %v557_v30 = vmax.f32 %v437_v22, 0.0  ;;  %847 = vst.msk [vmem:[%s1740_s3 + $0x38] sm:$0xf] %vm832_vm1, %v1013_v23  ;;  %v1014_v31 = vpack.c.bf16 %v527_v25, %v527_v25 }
  0xf9   :  { %879 = vst.msk [vmem:[%s1740_s3 + $0xb8] sm:$0xf] %vm832_vm1, %v1045_v24  ;;  %v1046_v32 = vpack.c.bf16 %v559_v26, %v559_v26  ;;  %845 = vst.msk [vmem:[%s1740_s3 + $0x30] sm:$0xf] %vm832_vm1, %v1011_v27  ;;  %v1012_v34 = vpack.c.bf16 %v525_v29, %v525_v29  ;;  %v1116_v36 = vpop.f32.mrb[16].mxu0 }
  0xfa   :  { %877 = vst.msk [vmem:[%s1740_s3 + $0xb0] sm:$0xf] %vm832_vm1, %v1043_v28  ;;  %v1044_v35 = vpack.c.bf16 %v557_v30, %v557_v30  ;;  %v1148_v37 = vpop.f32.mrb[16].mxu1  ;;  %848 = vst.msk [vmem:[%s1740_s3 + $0x3c] sm:$0xf] %vm832_vm1, %v1014_v31  ;;  %v330_v38 = vadd.f32 %v1116_v36, %v1415_v33  ;;  %v321_v40 = vpop.f32.mrb[17].mxu0 }
  0xfb   :  { %880 = vst.msk [vmem:[%s1740_s3 + $0xbc] sm:$0xf] %vm832_vm1, %v1046_v32  ;;  %v458_v39 = vadd.f32 %v1148_v37, %v1415_v33  ;;  %v449_v41 = vpop.f32.mrb[17].mxu1  ;;  %846 = vst.msk [vmem:[%s1740_s3 + $0x34] sm:$0xf] %vm832_vm1, %v1012_v34  ;;  %v322_v42 = vadd.f32 %v1415_v33, %v321_v40  ;;  %v1117_v44 = vpop.f32.mrb[18].mxu0 }
  0xfc   :  { %878 = vst.msk [vmem:[%s1740_s3 + $0xb4] sm:$0xf] %vm832_vm1, %v1044_v35  ;;  %v450_v43 = vadd.f32 %v1415_v33, %v449_v41  ;;  %v1149_v45 = vpop.f32.mrb[18].mxu1  ;;  %v530_v46 = vmax.f32 %v330_v38, 0.0  ;;  %v333_v48 = vadd.f32 %v1117_v44, %v1415_v33  ;;  %v324_v50 = vpop.f32.mrb[19].mxu0 }
  0xfd   :  { %v562_v47 = vmax.f32 %v458_v39, 0.0  ;;  %v461_v49 = vadd.f32 %v1149_v45, %v1415_v33  ;;  %v452_v51 = vpop.f32.mrb[19].mxu1  ;;  %v528_v52 = vmax.f32 %v322_v42, 0.0  ;;  %v325_v54 = vadd.f32 %v1415_v33, %v324_v50 }
  0xfe   :  { %v560_v53 = vmax.f32 %v450_v43, 0.0  ;;  %v453_v55 = vadd.f32 %v1415_v33, %v452_v51  ;;  %v1017_v56 = vpack.c.bf16 %v530_v46, %v530_v46  ;;  %v531_v58 = vmax.f32 %v333_v48, 0.0 }
  0xff   :  { %v1049_v57 = vpack.c.bf16 %v562_v47, %v562_v47  ;;  %v563_v59 = vmax.f32 %v461_v49, 0.0  ;;  %v1015_v60 = vpack.c.bf16 %v528_v52, %v528_v52  ;;  %v529_v62 = vmax.f32 %v325_v54, 0.0 }
 0x100   :  { %v1047_v61 = vpack.c.bf16 %v560_v53, %v560_v53  ;;  %v561_v63 = vmax.f32 %v453_v55, 0.0  ;;  %851 = vst.msk [vmem:[%s1740_s3 + $0x48] sm:$0xf] %vm832_vm1, %v1017_v56  ;;  %v1018_v0 = vpack.c.bf16 %v531_v58, %v531_v58 }
 0x101   :  { %883 = vst.msk [vmem:[%s1740_s3 + $0xc8] sm:$0xf] %vm832_vm1, %v1049_v57  ;;  %v1050_v1 = vpack.c.bf16 %v563_v59, %v563_v59  ;;  %849 = vst.msk [vmem:[%s1740_s3 + $0x40] sm:$0xf] %vm832_vm1, %v1015_v60  ;;  %v1016_v2 = vpack.c.bf16 %v529_v62, %v529_v62  ;;  %v1120_v4 = vpop.f32.mrb[20].mxu0 }
 0x102   :  { %881 = vst.msk [vmem:[%s1740_s3 + $0xc0] sm:$0xf] %vm832_vm1, %v1047_v61  ;;  %v1048_v3 = vpack.c.bf16 %v561_v63, %v561_v63  ;;  %v1152_v5 = vpop.f32.mrb[20].mxu1  ;;  %852 = vst.msk [vmem:[%s1740_s3 + $0x4c] sm:$0xf] %vm832_vm1, %v1018_v0  ;;  %v346_v6 = vadd.f32 %v1120_v4, %v1415_v33  ;;  %v337_v8 = vpop.f32.mrb[21].mxu0 }
 0x103   :  { %884 = vst.msk [vmem:[%s1740_s3 + $0xcc] sm:$0xf] %vm832_vm1, %v1050_v1  ;;  %v474_v7 = vadd.f32 %v1152_v5, %v1415_v33  ;;  %v465_v9 = vpop.f32.mrb[21].mxu1  ;;  %850 = vst.msk [vmem:[%s1740_s3 + $0x44] sm:$0xf] %vm832_vm1, %v1016_v2  ;;  %v338_v10 = vadd.f32 %v1415_v33, %v337_v8  ;;  %v1121_v12 = vpop.f32.mrb[22].mxu0 }
 0x104   :  { %882 = vst.msk [vmem:[%s1740_s3 + $0xc4] sm:$0xf] %vm832_vm1, %v1048_v3  ;;  %v466_v11 = vadd.f32 %v1415_v33, %v465_v9  ;;  %v1153_v13 = vpop.f32.mrb[22].mxu1  ;;  %v534_v14 = vmax.f32 %v346_v6, 0.0  ;;  %v349_v16 = vadd.f32 %v1121_v12, %v1415_v33  ;;  %v340_v18 = vpop.f32.mrb[23].mxu0 }
 0x105   :  { %v566_v15 = vmax.f32 %v474_v7, 0.0  ;;  %v477_v17 = vadd.f32 %v1153_v13, %v1415_v33  ;;  %v468_v19 = vpop.f32.mrb[23].mxu1  ;;  %v532_v20 = vmax.f32 %v338_v10, 0.0  ;;  %v341_v22 = vadd.f32 %v1415_v33, %v340_v18 }
 0x106   :  { %v564_v21 = vmax.f32 %v466_v11, 0.0  ;;  %v469_v23 = vadd.f32 %v1415_v33, %v468_v19  ;;  %v1021_v24 = vpack.c.bf16 %v534_v14, %v534_v14  ;;  %v535_v26 = vmax.f32 %v349_v16, 0.0 }
 0x107   :  { %v1053_v25 = vpack.c.bf16 %v566_v15, %v566_v15  ;;  %v567_v27 = vmax.f32 %v477_v17, 0.0  ;;  %v1019_v28 = vpack.c.bf16 %v532_v20, %v532_v20  ;;  %v533_v30 = vmax.f32 %v341_v22, 0.0 }
 0x108   :  { %v1051_v29 = vpack.c.bf16 %v564_v21, %v564_v21  ;;  %v565_v31 = vmax.f32 %v469_v23, 0.0  ;;  %855 = vst.msk [vmem:[%s1740_s3 + $0x58] sm:$0xf] %vm832_vm1, %v1021_v24  ;;  %v1022_v32 = vpack.c.bf16 %v535_v26, %v535_v26 }
 0x109   :  { %887 = vst.msk [vmem:[%s1740_s3 + $0xd8] sm:$0xf] %vm832_vm1, %v1053_v25  ;;  %v1054_v34 = vpack.c.bf16 %v567_v27, %v567_v27  ;;  %853 = vst.msk [vmem:[%s1740_s3 + $0x50] sm:$0xf] %vm832_vm1, %v1019_v28  ;;  %v1020_v35 = vpack.c.bf16 %v533_v30, %v533_v30  ;;  %v1124_v37 = vpop.f32.mrb[24].mxu0 }
 0x10a   :  { %885 = vst.msk [vmem:[%s1740_s3 + $0xd0] sm:$0xf] %vm832_vm1, %v1051_v29  ;;  %v1052_v36 = vpack.c.bf16 %v565_v31, %v565_v31  ;;  %v1156_v38 = vpop.f32.mrb[24].mxu1  ;;  %856 = vst.msk [vmem:[%s1740_s3 + $0x5c] sm:$0xf] %vm832_vm1, %v1022_v32  ;;  %v362_v39 = vadd.f32 %v1124_v37, %v1415_v33  ;;  %v353_v41 = vpop.f32.mrb[25].mxu0 }
 0x10b   :  { %888 = vst.msk [vmem:[%s1740_s3 + $0xdc] sm:$0xf] %vm832_vm1, %v1054_v34  ;;  %v490_v40 = vadd.f32 %v1156_v38, %v1415_v33  ;;  %v481_v42 = vpop.f32.mrb[25].mxu1  ;;  %854 = vst.msk [vmem:[%s1740_s3 + $0x54] sm:$0xf] %vm832_vm1, %v1020_v35  ;;  %v354_v43 = vadd.f32 %v1415_v33, %v353_v41  ;;  %v1125_v45 = vpop.f32.mrb[26].mxu0 }
 0x10c   :  { %886 = vst.msk [vmem:[%s1740_s3 + $0xd4] sm:$0xf] %vm832_vm1, %v1052_v36  ;;  %v482_v44 = vadd.f32 %v1415_v33, %v481_v42  ;;  %v1157_v46 = vpop.f32.mrb[26].mxu1  ;;  %v538_v47 = vmax.f32 %v362_v39, 0.0  ;;  %v365_v49 = vadd.f32 %v1125_v45, %v1415_v33  ;;  %v356_v51 = vpop.f32.mrb[27].mxu0 }
 0x10d   :  { %v570_v48 = vmax.f32 %v490_v40, 0.0  ;;  %v493_v50 = vadd.f32 %v1157_v46, %v1415_v33  ;;  %v484_v52 = vpop.f32.mrb[27].mxu1  ;;  %v536_v53 = vmax.f32 %v354_v43, 0.0  ;;  %v357_v55 = vadd.f32 %v1415_v33, %v356_v51 }
 0x10e   :  { %v568_v54 = vmax.f32 %v482_v44, 0.0  ;;  %v485_v56 = vadd.f32 %v1415_v33, %v484_v52  ;;  %v1025_v57 = vpack.c.bf16 %v538_v47, %v538_v47  ;;  %v539_v59 = vmax.f32 %v365_v49, 0.0 }
 0x10f   :  { %v1057_v58 = vpack.c.bf16 %v570_v48, %v570_v48  ;;  %v571_v60 = vmax.f32 %v493_v50, 0.0  ;;  %v1023_v61 = vpack.c.bf16 %v536_v53, %v536_v53  ;;  %v537_v63 = vmax.f32 %v357_v55, 0.0 }
 0x110   :  { %v1055_v62 = vpack.c.bf16 %v568_v54, %v568_v54  ;;  %v569_v0 = vmax.f32 %v485_v56, 0.0  ;;  %859 = vst.msk [vmem:[%s1740_s3 + $0x68] sm:$0xf] %vm832_vm1, %v1025_v57  ;;  %v1026_v1 = vpack.c.bf16 %v539_v59, %v539_v59 }
 0x111   :  { %891 = vst.msk [vmem:[%s1740_s3 + $0xe8] sm:$0xf] %vm832_vm1, %v1057_v58  ;;  %v1058_v2 = vpack.c.bf16 %v571_v60, %v571_v60  ;;  %857 = vst.msk [vmem:[%s1740_s3 + $0x60] sm:$0xf] %vm832_vm1, %v1023_v61  ;;  %v1024_v3 = vpack.c.bf16 %v537_v63, %v537_v63  ;;  %v1128_v5 = vpop.f32.mrb[28].mxu0 }
 0x112   :  { %889 = vst.msk [vmem:[%s1740_s3 + $0xe0] sm:$0xf] %vm832_vm1, %v1055_v62  ;;  %v1056_v4 = vpack.c.bf16 %v569_v0, %v569_v0  ;;  %v1160_v6 = vpop.f32.mrb[28].mxu1  ;;  %860 = vst.msk [vmem:[%s1740_s3 + $0x6c] sm:$0xf] %vm832_vm1, %v1026_v1  ;;  %v378_v7 = vadd.f32 %v1128_v5, %v1415_v33  ;;  %v369_v9 = vpop.f32.mrb[29].mxu0 }
 0x113   :  { %892 = vst.msk [vmem:[%s1740_s3 + $0xec] sm:$0xf] %vm832_vm1, %v1058_v2  ;;  %v506_v8 = vadd.f32 %v1160_v6, %v1415_v33  ;;  %v497_v10 = vpop.f32.mrb[29].mxu1  ;;  %858 = vst.msk [vmem:[%s1740_s3 + $0x64] sm:$0xf] %vm832_vm1, %v1024_v3  ;;  %v370_v11 = vadd.f32 %v1415_v33, %v369_v9  ;;  %v1129_v13 = vpop.f32.mrb[30].mxu0 }
 0x114   :  { %890 = vst.msk [vmem:[%s1740_s3 + $0xe4] sm:$0xf] %vm832_vm1, %v1056_v4  ;;  %v498_v12 = vadd.f32 %v1415_v33, %v497_v10  ;;  %v1161_v14 = vpop.f32.mrb[30].mxu1  ;;  %v542_v15 = vmax.f32 %v378_v7, 0.0  ;;  %v381_v17 = vadd.f32 %v1129_v13, %v1415_v33  ;;  %v372_v19 = vpop.f32.mrb[31].mxu0 }
 0x115   :  { %v574_v16 = vmax.f32 %v506_v8, 0.0  ;;  %v509_v18 = vadd.f32 %v1161_v14, %v1415_v33  ;;  %v500_v20 = vpop.f32.mrb[31].mxu1  ;;  %v540_v21 = vmax.f32 %v370_v11, 0.0  ;;  %v373_v23 = vadd.f32 %v1415_v33, %v372_v19 }
 0x116   :  { %v572_v22 = vmax.f32 %v498_v12, 0.0  ;;  %v501_v24 = vadd.f32 %v1415_v33, %v500_v20  ;;  %v1029_v25 = vpack.c.bf16 %v542_v15, %v542_v15  ;;  %v543_v27 = vmax.f32 %v381_v17, 0.0 }
 0x117   :  { %v1061_v26 = vpack.c.bf16 %v574_v16, %v574_v16  ;;  %v575_v28 = vmax.f32 %v509_v18, 0.0  ;;  %v1027_v29 = vpack.c.bf16 %v540_v21, %v540_v21  ;;  %v541_v31 = vmax.f32 %v373_v23, 0.0 }
 0x118   :  { %v1059_v30 = vpack.c.bf16 %v572_v22, %v572_v22  ;;  %v573_v32 = vmax.f32 %v501_v24, 0.0  ;;  %863 = vst.msk [vmem:[%s1740_s3 + $0x78] sm:$0xf] %vm832_vm1, %v1029_v25  ;;  %v1030_v34 = vpack.c.bf16 %v543_v27, %v543_v27 }
 0x119   :  { %895 = vst.msk [vmem:[%s1740_s3 + $0xf8] sm:$0xf] %vm832_vm1, %v1061_v26  ;;  %v1062_v33 = vpack.c.bf16 %v575_v28, %v575_v28  ;;  %861 = vst.msk [vmem:[%s1740_s3 + $0x70] sm:$0xf] %vm832_vm1, %v1027_v29  ;;  %v1028_v35 = vpack.c.bf16 %v541_v31, %v541_v31 }
 0x11a   :  { %893 = vst.msk [vmem:[%s1740_s3 + $0xf0] sm:$0xf] %vm832_vm1, %v1059_v30  ;;  %v1060_v36 = vpack.c.bf16 %v573_v32, %v573_v32  ;;  %864 = vst.msk [vmem:[%s1740_s3 + $0x7c] sm:$0xf] %vm832_vm1, %v1030_v34 }
 0x11b   :  { %896 = vst.msk [vmem:[%s1740_s3 + $0xfc] sm:$0xf] %vm832_vm1, %v1062_v33  ;;  %862 = vst.msk [vmem:[%s1740_s3 + $0x74] sm:$0xf] %vm832_vm1, %v1028_v35 }
 0x11c   :  { %894 = vst.msk [vmem:[%s1740_s3 + $0xf4] sm:$0xf] %vm832_vm1, %v1060_v36 }

// kernel: _lambda_.7
= control target key start
LH: loop header
LB: loop body
LE: loop exit
PB: predicated region body
PF: predicated region fallthrough
CT: control target
= control target key end

     0   :  { %vm108_vm0 = vcmask 1043456   ;;  %vm83_vm1 = vcmask 64512   ;;  %s564_s0 = inlined_call_operand.vmem [shape: bf16[128,8], index: 0, kind: input, shape index: {}]   ;;  %s565_s1 = inlined_call_operand.vmem [shape: bf16[8,32], index: 1, kind: input, shape index: {}]   ;;  %s566_s2 = inlined_call_operand.vmem [shape: f32[1,32], index: 2, kind: input, shape index: {}]   ;;  %s567_s3 = inlined_call_operand.vmem [shape: bf16[128,32], index: 3, kind: input, shape index: {}]   ;;  %s568_s4 = inlined_call_operand.hbm [shape: f32[128,32], index: 4, kind: output, shape index: {}]  }
   0x1   :  { %v35_v0 = vld [vmem:[%s565_s1] sm:$0xf]  ;;  %v398_v4 = vld [vmem:[%s564_s0 + $0x8] sm:$0xff]   ;;  %v400_v6 = vld [vmem:[%s564_s0 + $0x10] sm:$0xff]  }
   0x2   :  { %v396_v1 = vld [vmem:[%s564_s0] sm:$0xff]   ;;  %391 = vmatprep.subr.msk.bf16.mxu0 %vm108_vm0, %v35_v0  ;;  %392 = vmatprep.subr.msk.bf16.mxu1 %vm108_vm0, %v35_v0  ;;  %v110_v2 = vsel %vm108_vm0, %v35_v0, 0  ;;  %v399_v5 = vld [vmem:[%s564_s0 + $0x28] sm:$0xff]   ;;  %v401_v7 = vld [vmem:[%s564_s0 + $0x30] sm:$0xff]  }
   0x3   :  { %372 = vmatpush3.bf16.msra.mxu0 %v110_v2  ;;  %390 = vmatpush3.bf16.msra.mxu1 %v110_v2  ;;  %v397_v3 = vld [vmem:[%s564_s0 + $0x20] sm:$0xff]  }
   0x4   :  { %373 = vmatprep.mubr.msk.bf16.mxu0 %vm83_vm1, %v396_v1  ;;  %381 = vmatprep.mubr.msk.bf16.mxu1 %vm83_vm1, %v397_v3 }
   0x6   :  { %374 = vmatmul.mubr.msk.bf16.vlgmr.msra.gmra.mrb[0].mxu0 %vm83_vm1, %v398_v4  ;;  %382 = vmatmul.mubr.msk.bf16.vlgmr.msra.gmra.mrb[0].mxu1 %vm83_vm1, %v399_v5 }
   0x7   :  { %377 = vmatprep.mubr.msk.bf16.mxu0 %vm83_vm1, %v400_v6  ;;  %385 = vmatprep.mubr.msk.bf16.mxu1 %vm83_vm1, %v401_v7 }
   0x8   :  { %9 = vsyncpa [#allocation3], 0  ;;  %v402_v8 = vld [vmem:[%s564_s0 + $0x18] sm:$0xff]   ;;  %v355_v10 = vld [vmem:[%s567_s3 + $0x8] sm:$0xff]   ;;  %vm273_vm2 = vcmask 261120  }
   0x9   :  { %v403_v9 = vld [vmem:[%s564_s0 + $0x38] sm:$0xff]   ;;  %v359_v11 = vld [vmem:[%s567_s3 + $0x28] sm:$0xff]   ;;  %v324_v12 = vld [vmem:[%s567_s3] sm:$0xff]   ;;  %v329_v15 = vunpack.c.l.bf16 %v355_v10  ;;  %v330_v23 = vunpack.c.h.bf16 %v355_v10 }
   0xa   :  { %v503_v13 = vld [vmem:[%s566_s2] ss:$0 sm:$0xff]  ;;  %v345_v17 = vunpack.c.l.bf16 %v359_v11  ;;  %v325_v18 = vunpack.c.l.bf16 %v324_v12  ;;  %v346_v24 = vunpack.c.h.bf16 %v359_v11  ;;  %v326_v29 = vunpack.c.h.bf16 %v324_v12  ;;  %v357_v41 = vld [vmem:[%s567_s3 + $0x18] sm:$0xff]   ;;  %v356_v47 = vld [vmem:[%s567_s3 + $0x10] sm:$0xff]  }
   0xb   :  { %v358_v14 = vld [vmem:[%s567_s3 + $0x20] sm:$0xff]   ;;  %v361_v46 = vld [vmem:[%s567_s3 + $0x38] sm:$0xff]   ;;  %v360_v52 = vld [vmem:[%s567_s3 + $0x30] sm:$0xff]   ;;  %v337_v56 = vunpack.c.l.bf16 %v357_v41  ;;  %v333_v61 = vunpack.c.l.bf16 %v356_v47  ;;  %v338_v3 = vunpack.c.h.bf16 %v357_v41  ;;  %s428_s3 = smov [#allocation2]  }
   0xc   :  { %v341_v22 = vunpack.c.l.bf16 %v358_v14  ;;  %v342_v35 = vunpack.c.h.bf16 %v358_v14  ;;  %v353_v60 = vunpack.c.l.bf16 %v361_v46  ;;  %v349_v2 = vunpack.c.l.bf16 %v360_v52  ;;  %s295_s22 = sshll.u32 %s428_s3, 4  ;;  %s296_s22 = int_to_ptr.vmem [resolvable:$true] %s295_s22 }
   0xd   :  { %s404_s1 = scalar_lea.vmem %s296_s22, 2048  ;;  %p409_p1 = scmp.lt.s32.totalorder %s296_s22, %s296_s22 }
   0xe   :  { %378 = vmatmul.mubr.msk.bf16.gmra.mrb[4].mxu0 %vm83_vm1, %v402_v8  ;;  %386 = vmatmul.mubr.msk.bf16.gmra.mrb[4].mxu1 %vm83_vm1, %v403_v9  ;;  %v354_v8 = vunpack.c.h.bf16 %v361_v46  ;;  %v334_v9 = vunpack.c.h.bf16 %v356_v47  ;;  %p405_p0 = scmp.ne.s32.totalorder %s296_s22, %s404_s1  ;;  %p410_p2 = scmp.lt.s32.totalorder %s404_s1, %s404_s1 }
  0x10   :  { %p411_p3 = por %p410_p2, %p409_p1 }
  0x12   :  { %p412_p4 = pnand %p411_p3, %p405_p0 }
  0xd9   :  { %v375_v16 = vpop.f32.mrb[0].mxu0  ;;  %v383_v20 = vpop.f32.mrb[0].mxu1 }
  0xda   :  { %v155_v19 = vadd.f32 %v375_v16, %v503_v13  ;;  %v146_v21 = vpop.f32.mrb[1].mxu0  ;;  %v187_v25 = vadd.f32 %v383_v20, %v503_v13  ;;  %v178_v27 = vpop.f32.mrb[1].mxu1  ;;  %v350_v16 = vunpack.c.h.bf16 %v360_v52 }
  0xdb   :  { %v147_v26 = vadd.f32 %v503_v13, %v146_v21  ;;  %v376_v28 = vpop.f32.mrb[2].mxu0  ;;  %v179_v31 = vadd.f32 %v503_v13, %v178_v27  ;;  %v384_v33 = vpop.f32.mrb[2].mxu1 }
  0xdc   :  { %v243_v30 = vadd.f32 %v329_v15, %v155_v19  ;;  %v158_v32 = vadd.f32 %v376_v28, %v503_v13  ;;  %v149_v34 = vpop.f32.mrb[3].mxu0  ;;  %v251_v36 = vadd.f32 %v345_v17, %v187_v25  ;;  %v190_v38 = vadd.f32 %v384_v33, %v503_v13  ;;  %v181_v40 = vpop.f32.mrb[3].mxu1 }
  0xdd   :  { %v241_v37 = vadd.f32 %v325_v18, %v147_v26  ;;  %v150_v39 = vadd.f32 %v503_v13, %v149_v34  ;;  %v249_v43 = vadd.f32 %v341_v22, %v179_v31  ;;  %v182_v45 = vadd.f32 %v503_v13, %v181_v40 }
  0xde   :  { %v259_v42 = vmax.f32 %v243_v30, 0.0  ;;  %v244_v44 = vadd.f32 %v330_v23, %v158_v32  ;;  %v267_v48 = vmax.f32 %v251_v36, 0.0  ;;  %v252_v50 = vadd.f32 %v346_v24, %v190_v38 }
  0xdf   :  { %v257_v49 = vmax.f32 %v241_v37, 0.0  ;;  %v242_v51 = vadd.f32 %v326_v29, %v150_v39  ;;  %v265_v53 = vmax.f32 %v249_v43, 0.0  ;;  %v250_v55 = vadd.f32 %v342_v35, %v182_v45 }
  0xe0   :  { %276 = vst.msk [vmem:[#allocation2 + $0x10] sm:$0xff] %vm273_vm2, %v259_v42  ;;  %v260_v54 = vmax.f32 %v244_v44, 0.0  ;;  %284 = vst.msk [vmem:[#allocation2 + $0x50] sm:$0xff] %vm273_vm2, %v267_v48  ;;  %v268_v57 = vmax.f32 %v252_v50, 0.0 }
  0xe1   :  { %274 = vst.msk [vmem:[#allocation2] sm:$0xff] %vm273_vm2, %v257_v49  ;;  %v258_v58 = vmax.f32 %v242_v51, 0.0  ;;  %v379_v59 = vpop.f32.mrb[4].mxu0  ;;  %282 = vst.msk [vmem:[#allocation2 + $0x40] sm:$0xff] %vm273_vm2, %v265_v53  ;;  %v266_v62 = vmax.f32 %v250_v55, 0.0  ;;  %v387_v0 = vpop.f32.mrb[4].mxu1 }
  0xe2   :  { %277 = vst.msk [vmem:[#allocation2 + $0x18] sm:$0xff] %vm273_vm2, %v260_v54  ;;  %v171_v63 = vadd.f32 %v379_v59, %v503_v13  ;;  %v162_v1 = vpop.f32.mrb[5].mxu0  ;;  %285 = vst.msk [vmem:[#allocation2 + $0x58] sm:$0xff] %vm273_vm2, %v268_v57  ;;  %v203_v4 = vadd.f32 %v387_v0, %v503_v13  ;;  %v194_v6 = vpop.f32.mrb[5].mxu1 }
  0xe3   :  { %275 = vst.msk [vmem:[#allocation2 + $0x8] sm:$0xff] %vm273_vm2, %v258_v58  ;;  %v163_v5 = vadd.f32 %v503_v13, %v162_v1  ;;  %v380_v7 = vpop.f32.mrb[6].mxu0  ;;  %283 = vst.msk [vmem:[#allocation2 + $0x48] sm:$0xff] %vm273_vm2, %v266_v62  ;;  %v195_v11 = vadd.f32 %v503_v13, %v194_v6  ;;  %v388_v14 = vpop.f32.mrb[6].mxu1 }
  0xe4   :  { %v247_v10 = vadd.f32 %v337_v56, %v171_v63  ;;  %v174_v12 = vadd.f32 %v380_v7, %v503_v13  ;;  %v165_v15 = vpop.f32.mrb[7].mxu0  ;;  %v255_v17 = vadd.f32 %v353_v60, %v203_v4  ;;  %v206_v19 = vadd.f32 %v388_v14, %v503_v13  ;;  %v197_v21 = vpop.f32.mrb[7].mxu1 }
  0xe5   :  { %v245_v18 = vadd.f32 %v333_v61, %v163_v5  ;;  %v166_v20 = vadd.f32 %v503_v13, %v165_v15  ;;  %v253_v23 = vadd.f32 %v349_v2, %v195_v11  ;;  %v198_v25 = vadd.f32 %v503_v13, %v197_v21 }
  0xe6   :  { %v263_v22 = vmax.f32 %v247_v10, 0.0  ;;  %v248_v24 = vadd.f32 %v338_v3, %v174_v12  ;;  %v271_v26 = vmax.f32 %v255_v17, 0.0  ;;  %v256_v28 = vadd.f32 %v354_v8, %v206_v19 }
  0xe7   :  { %v261_v27 = vmax.f32 %v245_v18, 0.0  ;;  %v246_v29 = vadd.f32 %v334_v9, %v166_v20  ;;  %v269_v30 = vmax.f32 %v253_v23, 0.0  ;;  %v254_v32 = vadd.f32 %v350_v16, %v198_v25 }
  0xe8   :  { %280 = vst.msk [vmem:[#allocation2 + $0x30] sm:$0xff] %vm273_vm2, %v263_v22  ;;  %v264_v31 = vmax.f32 %v248_v24, 0.0  ;;  %288 = vst.msk [vmem:[#allocation2 + $0x70] sm:$0xff] %vm273_vm2, %v271_v26  ;;  %v272_v33 = vmax.f32 %v256_v28, 0.0 }
  0xe9   :  { %278 = vst.msk [vmem:[#allocation2 + $0x20] sm:$0xff] %vm273_vm2, %v261_v27  ;;  %v262_v34 = vmax.f32 %v246_v29, 0.0  ;;  %286 = vst.msk [vmem:[#allocation2 + $0x60] sm:$0xff] %vm273_vm2, %v269_v30  ;;  %v270_v13 = vmax.f32 %v254_v32, 0.0 }
  0xea   :  { %281 = vst.msk [vmem:[#allocation2 + $0x38] sm:$0xff] %vm273_vm2, %v264_v31  ;;  %289 = vst.msk [vmem:[#allocation2 + $0x78] sm:$0xff] %vm273_vm2, %v272_v33 }
  0xeb   :  { %279 = vst.msk [vmem:[#allocation2 + $0x28] sm:$0xff] %vm273_vm2, %v262_v34  ;;  %287 = vst.msk [vmem:[#allocation2 + $0x68] sm:$0xff] %vm273_vm2, %v270_v13 }
  0xec   :  { %415 = shalt.err (!%p412_p4)
}
  0xed   :  { %s416_s25 = scalar_lea.hbm %s568_s4, 2048 }
  0xee   :  { %p417_p5 = scmp.ne.s32.totalorder %s568_s4, %s416_s25  ;;  %p420_p6 = scmp.lt.u32.totalorder %s416_s25, %s568_s4 }
  0xf0   :  { %p422_p7 = pnand %p420_p6, %p417_p5 }
  0xf2   :  { %425 = shalt.err (!%p422_p7)
}
  0xf3   :  { %s429_s30 = smov 128   ;;  %s430_s5 = smov 8  }
  0xf4   :  { %301 = dma.vmem_to_hbm [thread:$0]  %s296_s22, 2048, %s568_s4, [#allocation3], %s429_s30, %s429_s30, %s430_s5  }
  0xf5   :  { %426 = dma.done.wait [#allocation3], 2048  }
  0xf6   :  { %427 = vsyncadd [#allocation3], 4294965248 }
  0xf7   :  { %305 = vsyncpa [#allocation3], 1 }

// kernel: _lambda_.6
= control target key start
LH: loop header
LB: loop body
LE: loop exit
PB: predicated region body
PF: predicated region fallthrough
CT: control target
= control target key end

     0   :  { %vm54_vm0 = vcmask 130048   ;;  %vm240_vm1 = vcmask 257024   ;;  %s479_s1 = inlined_call_operand.vmem [shape: bf16[16,32], index: 1, kind: input, shape index: {}]   ;;  %s480_s0 = inlined_call_operand.vmem [shape: f32[128,16], index: 0, kind: input, shape index: {}]   ;;  %s481_s2 = inlined_call_operand.vmem [shape: f32[1,32], index: 2, kind: input, shape index: {}]   ;;  %s482_s3 = inlined_call_operand.vmem [shape: bf16[128,32], index: 3, kind: output, shape index: {}]  }
   0x1   :  { %v332_v0 = vld [vmem:[%s479_s1] sm:$0xff]   ;;  %v16_v2 = vld [vmem:[%s480_s0 + $0x8] sm:$0xff]  ;;  %v17_v6 = vld [vmem:[%s480_s0 + $0x10] sm:$0xff] }
   0x2   :  { %v15_v1 = vld [vmem:[%s480_s0] sm:$0xff]  ;;  %312 = vmatprep.subr.bf16.mxu0 %v332_v0  ;;  %330 = vmatprep.subr.bf16.mxu1 %v332_v0  ;;  %v24_v5 = vld [vmem:[%s480_s0 + $0x48] sm:$0xff]  ;;  %v18_v7 = vld [vmem:[%s480_s0 + $0x18] sm:$0xff] }
   0x3   :  { %v23_v3 = vld [vmem:[%s480_s0 + $0x40] sm:$0xff]  ;;  %v31_v4 = vpack.c.bf16 %v16_v2, %v15_v1  ;;  %313 = vmatpush3.bf16.msra.mxu0 %v332_v0  ;;  %331 = vmatpush3.bf16.msra.mxu1 %v332_v0  ;;  %v32_v9 = vpack.c.bf16 %v18_v7, %v17_v6  ;;  %v25_v10 = vld [vmem:[%s480_s0 + $0x50] sm:$0xff]  ;;  %v26_v11 = vld [vmem:[%s480_s0 + $0x58] sm:$0xff] }
   0x4   :  { %v35_v8 = vpack.c.bf16 %v24_v5, %v23_v3  ;;  %v19_v12 = vld [vmem:[%s480_s0 + $0x20] sm:$0xff]  ;;  %v36_v13 = vpack.c.bf16 %v26_v11, %v25_v10  ;;  %v20_v14 = vld [vmem:[%s480_s0 + $0x28] sm:$0xff]  ;;  %v21_v19 = vld [vmem:[%s480_s0 + $0x30] sm:$0xff] }
   0x5   :  { %314 = vmatprep.mubr.msk.bf16.mxu0 %vm54_vm0, %v31_v4  ;;  %v27_v15 = vld [vmem:[%s480_s0 + $0x60] sm:$0xff]  ;;  %v28_v16 = vld [vmem:[%s480_s0 + $0x68] sm:$0xff]  ;;  %v33_v17 = vpack.c.bf16 %v20_v14, %v19_v12  ;;  %v22_v20 = vld [vmem:[%s480_s0 + $0x38] sm:$0xff] }
   0x6   :  { %322 = vmatprep.mubr.msk.bf16.mxu1 %vm54_vm0, %v35_v8  ;;  %v37_v18 = vpack.c.bf16 %v28_v16, %v27_v15  ;;  %315 = vmatmul.mubr.msk.bf16.vlgmr.msra.gmra.mrb[0].mxu0 %vm54_vm0, %v32_v9  ;;  %v29_v21 = vld [vmem:[%s480_s0 + $0x70] sm:$0xff]  ;;  %v30_v22 = vld [vmem:[%s480_s0 + $0x78] sm:$0xff]  ;;  %v34_v23 = vpack.c.bf16 %v22_v20, %v21_v19  ;;  %v261_v25 = vld [vmem:[%s481_s2] ss:$0 sm:$0xff] }
   0x7   :  { %323 = vmatmul.mubr.msk.bf16.vlgmr.msra.gmra.mrb[0].mxu1 %vm54_vm0, %v36_v13  ;;  %318 = vmatprep.mubr.msk.bf16.mxu0 %vm54_vm0, %v33_v17  ;;  %v38_v24 = vpack.c.bf16 %v30_v22, %v29_v21 }
   0x8   :  { %326 = vmatprep.mubr.msk.bf16.mxu1 %vm54_vm0, %v37_v18 }
   0xe   :  { %319 = vmatmul.mubr.msk.bf16.gmra.mrb[4].mxu0 %vm54_vm0, %v34_v23 }
   0xf   :  { %327 = vmatmul.mubr.msk.bf16.gmra.mrb[4].mxu1 %vm54_vm0, %v38_v24 }
  0xd9   :  { %v316_v26 = vpop.f32.mrb[0].mxu0 }
  0xda   :  { %v324_v27 = vpop.f32.mrb[0].mxu1  ;;  %v122_v28 = vadd.f32 %v316_v26, %v261_v25  ;;  %v113_v30 = vpop.f32.mrb[1].mxu0 }
  0xdb   :  { %v154_v29 = vadd.f32 %v324_v27, %v261_v25  ;;  %v145_v31 = vpop.f32.mrb[1].mxu1  ;;  %v114_v32 = vadd.f32 %v261_v25, %v113_v30  ;;  %v317_v34 = vpop.f32.mrb[2].mxu0 }
  0xdc   :  { %v146_v33 = vadd.f32 %v261_v25, %v145_v31  ;;  %v325_v35 = vpop.f32.mrb[2].mxu1  ;;  %v289_v36 = vpack.c.bf16 %v122_v28, %v122_v28  ;;  %v125_v38 = vadd.f32 %v317_v34, %v261_v25  ;;  %v116_v40 = vpop.f32.mrb[3].mxu0 }
  0xdd   :  { %v297_v37 = vpack.c.bf16 %v154_v29, %v154_v29  ;;  %v157_v39 = vadd.f32 %v325_v35, %v261_v25  ;;  %v148_v41 = vpop.f32.mrb[3].mxu1  ;;  %v287_v42 = vpack.c.bf16 %v114_v32, %v114_v32  ;;  %v117_v44 = vadd.f32 %v261_v25, %v116_v40 }
  0xde   :  { %v295_v43 = vpack.c.bf16 %v146_v33, %v146_v33  ;;  %v149_v45 = vadd.f32 %v261_v25, %v148_v41  ;;  %243 = vst.msk [vmem:[%s482_s3 + $0x8] sm:$0xf] %vm240_vm1, %v289_v36  ;;  %v290_v46 = vpack.c.bf16 %v125_v38, %v125_v38 }
  0xdf   :  { %251 = vst.msk [vmem:[%s482_s3 + $0x28] sm:$0xf] %vm240_vm1, %v297_v37  ;;  %v298_v47 = vpack.c.bf16 %v157_v39, %v157_v39  ;;  %241 = vst.msk [vmem:[%s482_s3] sm:$0xf] %vm240_vm1, %v287_v42  ;;  %v288_v48 = vpack.c.bf16 %v117_v44, %v117_v44 }
  0xe0   :  { %249 = vst.msk [vmem:[%s482_s3 + $0x20] sm:$0xf] %vm240_vm1, %v295_v43  ;;  %v296_v49 = vpack.c.bf16 %v149_v45, %v149_v45  ;;  %244 = vst.msk [vmem:[%s482_s3 + $0xc] sm:$0xf] %vm240_vm1, %v290_v46 }
  0xe1   :  { %252 = vst.msk [vmem:[%s482_s3 + $0x2c] sm:$0xf] %vm240_vm1, %v298_v47  ;;  %242 = vst.msk [vmem:[%s482_s3 + $0x4] sm:$0xf] %vm240_vm1, %v288_v48  ;;  %v320_v50 = vpop.f32.mrb[4].mxu0 }
  0xe2   :  { %250 = vst.msk [vmem:[%s482_s3 + $0x24] sm:$0xf] %vm240_vm1, %v296_v49  ;;  %v328_v51 = vpop.f32.mrb[4].mxu1  ;;  %v138_v52 = vadd.f32 %v320_v50, %v261_v25  ;;  %v129_v54 = vpop.f32.mrb[5].mxu0 }
  0xe3   :  { %v170_v53 = vadd.f32 %v328_v51, %v261_v25  ;;  %v161_v55 = vpop.f32.mrb[5].mxu1  ;;  %v130_v56 = vadd.f32 %v261_v25, %v129_v54  ;;  %v321_v58 = vpop.f32.mrb[6].mxu0 }
  0xe4   :  { %v162_v57 = vadd.f32 %v261_v25, %v161_v55  ;;  %v329_v59 = vpop.f32.mrb[6].mxu1  ;;  %v293_v60 = vpack.c.bf16 %v138_v52, %v138_v52  ;;  %v141_v62 = vadd.f32 %v321_v58, %v261_v25  ;;  %v132_v0 = vpop.f32.mrb[7].mxu0 }
  0xe5   :  { %v301_v61 = vpack.c.bf16 %v170_v53, %v170_v53  ;;  %v173_v63 = vadd.f32 %v329_v59, %v261_v25  ;;  %v164_v1 = vpop.f32.mrb[7].mxu1  ;;  %v291_v2 = vpack.c.bf16 %v130_v56, %v130_v56  ;;  %v133_v4 = vadd.f32 %v261_v25, %v132_v0 }
  0xe6   :  { %v299_v3 = vpack.c.bf16 %v162_v57, %v162_v57  ;;  %v165_v5 = vadd.f32 %v261_v25, %v164_v1  ;;  %247 = vst.msk [vmem:[%s482_s3 + $0x18] sm:$0xf] %vm240_vm1, %v293_v60  ;;  %v294_v6 = vpack.c.bf16 %v141_v62, %v141_v62 }
  0xe7   :  { %255 = vst.msk [vmem:[%s482_s3 + $0x38] sm:$0xf] %vm240_vm1, %v301_v61  ;;  %v302_v7 = vpack.c.bf16 %v173_v63, %v173_v63  ;;  %245 = vst.msk [vmem:[%s482_s3 + $0x10] sm:$0xf] %vm240_vm1, %v291_v2  ;;  %v292_v8 = vpack.c.bf16 %v133_v4, %v133_v4 }
  0xe8   :  { %253 = vst.msk [vmem:[%s482_s3 + $0x30] sm:$0xf] %vm240_vm1, %v299_v3  ;;  %v300_v9 = vpack.c.bf16 %v165_v5, %v165_v5  ;;  %248 = vst.msk [vmem:[%s482_s3 + $0x1c] sm:$0xf] %vm240_vm1, %v294_v6 }
  0xe9   :  { %256 = vst.msk [vmem:[%s482_s3 + $0x3c] sm:$0xf] %vm240_vm1, %v302_v7  ;;  %246 = vst.msk [vmem:[%s482_s3 + $0x14] sm:$0xf] %vm240_vm1, %v292_v8 }
  0xea   :  { %254 = vst.msk [vmem:[%s482_s3 + $0x34] sm:$0xf] %vm240_vm1, %v300_v9 }

// kernel: _lambda_.5
= control target key start
LH: loop header
LB: loop body
LE: loop exit
PB: predicated region body
PF: predicated region fallthrough
CT: control target
= control target key end

     0   :  { %s2125_s12 = smov 0   ;;  %s2127_s13 = smov 0   ;;  %s2465_s0 = inlined_call_operand.vmem [shape: bf16[2,9,2,9,16], index: 0, kind: input, shape index: {}]   ;;  %s2466_s1 = inlined_call_operand.vmem [shape: bf16[9,8,8], index: 1, kind: input, shape index: {}]   ;;  %s2467_s2 = inlined_call_operand.vmem [shape: f32[1,8], index: 2, kind: input, shape index: {}]   ;;  %s2468_s3 = inlined_call_operand.vmem [shape: bf16[2,64,8], index: 3, kind: output, shape index: {}]  }
   0x1   :  { %s2129_s14 = smov 0  }
   0x2 LB: > { %s25_s15 = sadd.s32 1, %s2098_s13  ;;  %p1691_p0 = scmp.ge.s32.totalorder %s2102_s14, 1  ;;  %s2102_s14 = sphi %s2129_s14, %s13_s14   ;;  %s2098_s13 = sphi %s2127_s13, %s2472_s13   ;;  %s2094_s12 = sphi %s2125_s12, %s2471_s12  }
   0x3   : > { %p27_p1 = scmp.ge.s32.totalorder %s25_s15, 2  ;;  %p151_p2 = scmp.lt.s32.totalorder %s2102_s14, 3 }
   0x5   : > { %s2474_s15 = smov (%p27_p1, %s25_s15), 0  ;;  %p152_p3 = pnand %p1691_p0, %p151_p2 }
   0x6   : > { %p179_p4 = scmp.lt.s32.totalorder (!%p152_p3), %s2094_s12, 1  ;;  %v1695_v0 = vld [vmem:[%s2466_s1 + $0x4] sm:$0xf] (!%p152_p3)  ;;  %vm251_vm0 = vcmask (!%p152_p3), 1043456   ;;  %v2151_v2 = vld [vmem:[%s2466_s1 + $0x10] sm:$0xf] (!%p152_p3) }
   0x7   : > { %155 = sbr.rel (%p152_p3) target bundleno = 431 (0x1af), region = 32  ;;  %2032 = vmatprep.subr.msk.bf16.mxu1 (!%p152_p3), %vm251_vm0, %v1695_v0  ;;  %v253_v1 = vsel (!%p152_p3), %vm251_vm0, %v1695_v0, 0  ;;  %v2156_v3 = vld [vmem:[%s2466_s1] sm:$0xf] (!%p152_p3)  ;;  %2036 = vmatprep.subr.msk.bf16.mxu0 (!%p152_p3), %vm251_vm0, %v2151_v2  ;;  %v2164_v4 = vsel (!%p152_p3), %vm251_vm0, %v2151_v2, 0  ;;  %s2104_s28 = smov (!%p152_p3), 120  }
   0x8   : > { %1877 = vmatpush3.bf16.msra.mxu1 (!%p152_p3), %v253_v1  ;;  %v2169_v5 = vld [vmem:[%s2466_s1 + $0x14] sm:$0xf] (!%p152_p3)  ;;  %1917 = vmatpush3.bf16.msra.mxu0 (!%p152_p3), %v2164_v4  ;;  %vm416_vm1 = vsmask.f32 (!%p152_p3), 3328  ;;  %vm417_vm2 = vsmask.f32 (!%p152_p3), 7440 }
   0x9   : > { %2033 = vmatprep.subr.msk.bf16.mxu1 (!%p152_p3), %vm251_vm0, %v2156_v3  ;;  %2038 = vmatprep.subr.msk.bf16.mxu0 (!%p152_p3), %vm251_vm0, %v2169_v5  ;;  %vm2234_vm3 = vmor (!%p152_p3), %vm416_vm1, %vm417_vm2  ;;  %vm238_vm4 = vcmask (!%p152_p3), 64512   ;;  %v1811_v35 = vld [vmem:[%s2467_s2] ss:$0 sm:$0xff] (!%p152_p3)  ;;  %vm1587_vm5 = vcmask (!%p152_p3), 60416  }
   0xe   : > { %s2476_s12 = smov (!%p179_p4, %s2094_s12), 1 }
   0xf   : > { %s2042_s24 = smul.u32 144, %s2476_s12  ;;  %s1822_s18 = sshll.u32 %s2476_s12, 5 }
  0x10   : > { %s2438_s21 = scalar_lea.vmem %s2468_s3, %s1822_s18 }
  0x11   : > { %s2180_s27 = scalar_lea.vmem %s2465_s0, %s2042_s24 }
  0x12   : > { %v2183_v6 = vld [vmem:[%s2180_s27] ss:$16 sps:$4 sm:$0xff]   ;;  %v2190_v8 = vld [vmem:[%s2180_s27 + $0x8] ss:$16 sps:$4 sm:$0xff]   ;;  %v1799_v19 = vld [vmem:[%s2180_s27 + $0x74] sm:$0x1] }
  0x13   : > { %v2186_v7 = vld [vmem:[%s2180_s27 + $0x20] ss:$16 sps:$4 sm:$0xff]   ;;  %230 = vrot.lane.b32.xlu0 %v2183_v6, %s2104_s28  ;;  %v2194_v9 = vld [vmem:[%s2180_s27 + $0x28] ss:$16 sps:$4 sm:$0xff]   ;;  %v1801_v22 = vld [vmem:[%s2180_s27 + $0x84] sm:$0x1] }
  0x14   : > { %232 = vrot.lane.b32.xlu1 %v2186_v7, %s2104_s28  ;;  %v2198_v10 = vld [vmem:[%s2180_s27 + $0x40] ss:$16 sps:$4 sm:$0xff]   ;;  %v2222_v16 = vld [vmem:[%s2180_s27 + $0x48] ss:$16 sps:$4 sm:$0xff]   ;;  %v1412_v24 = vshll.u32 %v1799_v19, 16  ;;  %v1426_v30 = vshll.u32 %v1801_v22, 16 }
  0x15   : > { %v2202_v11 = vld [vmem:[%s2180_s27 + $0x60] ss:$16 sps:$4 sm:$0xff]   ;;  %v2226_v17 = vld [vmem:[%s2180_s27 + $0x68] ss:$16 sps:$4 sm:$0xff]   ;;  %v1740_v48 = vld [vmem:[%s2180_s27 + $0xc] sm:$0x1] }
  0x16   : > { %v2206_v12 = vld [vmem:[%s2180_s27 + $0x10] ss:$16 sps:$4 sm:$0xff]   ;;  %v1414_v32 = vrot.slane %v1412_v24, 5  ;;  %v1428_v37 = vrot.slane %v1426_v30, 5  ;;  %v1739_v42 = vld [vmem:[%s2180_s27 + $0x8] sm:$0xf] }
  0x17   : > { %756 = vrot.lane.b32.xlu0 %v2190_v8, %s2104_s28  ;;  %v2210_v13 = vld [vmem:[%s2180_s27 + $0x30] ss:$16 sps:$4 sm:$0xff]   ;;  %v1741_v43 = vld [vmem:[%s2180_s27 + $0x18] sm:$0xf]  ;;  %v869_v44 = vshrl.u32 %v1739_v42, 16  ;;  %v872_v45 = vshll.u32 %v1739_v42, 16 }
  0x18   : > { %758 = vrot.lane.b32.xlu1 %v2194_v9, %s2104_s28  ;;  %v2214_v14 = vld [vmem:[%s2180_s27 + $0x50] ss:$16 sps:$4 sm:$0xff]   ;;  %v883_v46 = vshrl.u32 %v1741_v43, 16  ;;  %v886_v47 = vshll.u32 %v1741_v43, 16  ;;  %v1742_v49 = vld [vmem:[%s2180_s27 + $0x1c] sm:$0x1] }
  0x19   : > { %v2218_v15 = vld [vmem:[%s2180_s27 + $0x70] ss:$16 sps:$4 sm:$0xff]   ;;  %v871_v50 = vrot.slane %v869_v44, 4  ;;  %v874_v51 = vrot.slane %v872_v45, 5  ;;  %v1743_v54 = vld [vmem:[%s2180_s27 + $0x28] sm:$0xf] }
  0x1a   : > { %v1798_v18 = vld [vmem:[%s2180_s27 + $0x70] sm:$0xf]  ;;  %v1800_v20 = vld [vmem:[%s2180_s27 + $0x80] sm:$0xf]  ;;  %v885_v52 = vrot.slane %v883_v46, 4  ;;  %v888_v53 = vrot.slane %v886_v47, 5 }
  0x1b   : > { %234 = vrot.lane.b32.xlu0 %v2198_v10, %s2104_s28  ;;  %v1403_v21 = vshrl.u32 %v1798_v18, 16  ;;  %v1406_v23 = vshll.u32 %v1798_v18, 16  ;;  %v1417_v26 = vshrl.u32 %v1800_v20, 16  ;;  %v1420_v29 = vshll.u32 %v1800_v20, 16  ;;  %v1745_v55 = vld [vmem:[%s2180_s27 + $0x38] sm:$0xf] }
  0x1c   : > { %236 = vrot.lane.b32.xlu1 %v2202_v11, %s2104_s28  ;;  %v878_v56 = vshll.u32 %v1740_v48, 16  ;;  %v892_v57 = vshll.u32 %v1742_v49, 16  ;;  %v1744_v58 = vld [vmem:[%s2180_s27 + $0x2c] sm:$0x1]  ;;  %v897_v59 = vshrl.u32 %v1743_v54, 16  ;;  %v900_v60 = vshll.u32 %v1743_v54, 16 }
  0x1d   : > { %v1405_v25 = vrot.slane %v1403_v21, 4  ;;  %v1408_v27 = vrot.slane %v1406_v23, 5  ;;  %v1419_v28 = vrot.slane %v1417_v26, 4  ;;  %v1422_v33 = vrot.slane %v1420_v29, 5  ;;  %v1747_v1 = vld [vmem:[%s2180_s27 + $0x48] sm:$0xf] }
  0x1e   : > { %v875_v61 = vor.u32 %v874_v51, %v871_v50  ;;  %v889_v62 = vor.u32 %v888_v53, %v885_v52  ;;  %v911_v63 = vshrl.u32 %v1745_v55, 16  ;;  %v914_v0 = vshll.u32 %v1745_v55, 16  ;;  %v1749_v21 = vld [vmem:[%s2180_s27 + $0x58] sm:$0xf]  ;;  %v1746_v22 = vld [vmem:[%s2180_s27 + $0x3c] sm:$0x1] }
  0x1f   : > { %1206 = vrot.lane.b32.xlu0 %v2206_v12, %s2104_s28  ;;  %v1409_v31 = vor.u32 %v1408_v27, %v1405_v25  ;;  %v1423_v36 = vor.u32 %v1422_v33, %v1419_v28  ;;  %v880_v18 = vrot.slane %v878_v56, 5  ;;  %v894_v19 = vrot.slane %v892_v57, 5  ;;  %v1753_v44 = vld [vmem:[%s2180_s27 + $0x78] sm:$0xf]  ;;  %v400_v45 = vld [vmem:[%s2180_s27] sm:$0xf] }
  0x20   : > { %1208 = vrot.lane.b32.xlu1 %v2210_v13, %s2104_s28  ;;  %v906_v20 = vshll.u32 %v1744_v58, 16  ;;  %v899_v23 = vrot.slane %v897_v59, 4  ;;  %v902_v24 = vrot.slane %v900_v60, 5  ;;  %v925_v25 = vshrl.u32 %v1747_v1, 16  ;;  %v1750_v48 = vld [vmem:[%s2180_s27 + $0x5c] sm:$0x1] }
  0x21   : > { %v1410_v34 = vrot.slane %v1409_v31, 4  ;;  %v1424_v39 = vrot.slane %v1423_v36, 4  ;;  %v928_v26 = vshll.u32 %v1747_v1, 16  ;;  %v876_v27 = vrot.slane %v875_v61, 4  ;;  %v1748_v31 = vld [vmem:[%s2180_s27 + $0x4c] sm:$0x1] }
  0x22   : > { %v890_v28 = vrot.slane %v889_v62, 4  ;;  %v913_v29 = vrot.slane %v911_v63, 4  ;;  %v916_v30 = vrot.slane %v914_v0, 5  ;;  %v942_v33 = vshll.u32 %v1749_v21, 16  ;;  %v402_v53 = vld [vmem:[%s2180_s27 + $0x10] sm:$0xf] }
  0x23   : > { %1210 = vrot.lane.b32.xlu0 %v2214_v14, %s2104_s28  ;;  %v1415_v38 = vsel %vm2234_vm3, %v1410_v34, %v1414_v32  ;;  %v1429_v40 = vsel %vm2234_vm3, %v1424_v39, %v1428_v37  ;;  %v939_v32 = vshrl.u32 %v1749_v21, 16  ;;  %v333_v34 = vsel %vm251_vm0, %v2156_v3, 0  ;;  %v1751_v39 = vld [vmem:[%s2180_s27 + $0x68] sm:$0xf] }
  0x24   : > { %1212 = vrot.lane.b32.xlu1 %v2218_v15, %s2104_s28  ;;  %v2242_v41 = vcombine.low %v1415_v38, %v1429_v40  ;;  %v1007_v36 = vsel %vm251_vm0, %v2169_v5, 0  ;;  %v2259_v37 = vrot.slane %v906_v20, 5  ;;  %v920_v38 = vshll.u32 %v1746_v22, 16  ;;  %v2274_v63 = vld [vmem:[%s2466_s1 + $0x8] sm:$0xf] }
  0x25   : > { %v903_v40 = vor.u32 %v902_v24, %v899_v23  ;;  %v927_v42 = vrot.slane %v925_v25, 4  ;;  %v930_v43 = vrot.slane %v928_v26, 5  ;;  %v881_v46 = vsel %vm2234_vm3, %v876_v27, %v880_v18  ;;  %v2281_v22 = vld [vmem:[%s2466_s1 + $0x18] sm:$0xf]  ;;  %v1754_v25 = vld [vmem:[%s2180_s27 + $0x7c] sm:$0x1] }
  0x26   : > { %v895_v47 = vsel %vm2234_vm3, %v890_v28, %v894_v19  ;;  %v917_v3 = vor.u32 %v916_v30, %v913_v29  ;;  %v934_v49 = vshll.u32 %v1748_v31, 16  ;;  %v941_v5 = vrot.slane %v939_v32, 4  ;;  %v1752_v19 = vld [vmem:[%s2180_s27 + $0x6c] sm:$0x1]  ;;  %v401_v31 = vld [vmem:[%s2180_s27 + $0x4] sm:$0x1] }
  0x27   : > { %760 = vrot.lane.b32.xlu0 %v2222_v16, %s2104_s28  ;;  %v944_v50 = vrot.slane %v942_v33, 5  ;;  %v953_v51 = vshrl.u32 %v1751_v39, 16  ;;  %v956_v52 = vshll.u32 %v1751_v39, 16  ;;  %v967_v55 = vshrl.u32 %v1753_v44, 16 }
  0x28   : > { %762 = vrot.lane.b32.xlu1 %v2226_v17, %s2104_s28  ;;  %v970_v56 = vshll.u32 %v1753_v44, 16  ;;  %v420_v57 = vshrl.u32 %v400_v45, 16  ;;  %v423_v58 = vshll.u32 %v400_v45, 16  ;;  %v1756_v60 = vcombine.low %v881_v46, %v895_v47 }
  0x29   : > { %v904_v61 = vrot.slane %v903_v40, 4  ;;  %v922_v62 = vrot.slane %v920_v38, 5  ;;  %v931_v0 = vor.u32 %v930_v43, %v927_v42  ;;  %v918_v1 = vrot.slane %v917_v3, 4  ;;  %v403_v42 = vld [vmem:[%s2180_s27 + $0x14] sm:$0x1] }
  0x2a   : > { %v948_v18 = vshll.u32 %v1750_v48, 16  ;;  %v434_v20 = vshrl.u32 %v402_v53, 16  ;;  %v437_v21 = vshll.u32 %v402_v53, 16  ;;  %v2283_v23 = vrot.slane %v934_v49, 5  ;;  %v404_v43 = vld [vmem:[%s2180_s27 + $0x20] sm:$0xf] }
  0x2b   : > { %v945_v24 = vor.u32 %v944_v50, %v941_v5  ;;  %v955_v26 = vrot.slane %v953_v51, 4  ;;  %v958_v27 = vrot.slane %v956_v52, 5  ;;  %v969_v29 = vrot.slane %v967_v55, 4  ;;  %v406_v5 = vld [vmem:[%s2180_s27 + $0x30] sm:$0xf] }
  0x2c   : > { %v972_v30 = vrot.slane %v970_v56, 5  ;;  %v422_v32 = vrot.slane %v420_v57, 4  ;;  %v425_v33 = vrot.slane %v423_v58, 5  ;;  %v909_v38 = vsel %vm2234_vm3, %v904_v61, %v2259_v37  ;;  %v408_v58 = vld [vmem:[%s2180_s27 + $0x40] sm:$0xf] }
  0x2d   : > { %v932_v39 = vrot.slane %v931_v0, 4  ;;  %v962_v40 = vshll.u32 %v1752_v19, 16  ;;  %v923_v44 = vsel %vm2234_vm3, %v918_v1, %v922_v62  ;;  %v950_v45 = vrot.slane %v948_v18, 5  ;;  %v410_v0 = vld [vmem:[%s2180_s27 + $0x50] sm:$0xf] }
  0x2e   : > { %v436_v46 = vrot.slane %v434_v20, 4  ;;  %v439_v47 = vrot.slane %v437_v21, 5  ;;  %v946_v3 = vrot.slane %v945_v24, 4  ;;  %v959_v48 = vor.u32 %v958_v27, %v955_v26  ;;  %v405_v26 = vld [vmem:[%s2180_s27 + $0x24] sm:$0x1] }
  0x2f   : > { %v976_v37 = vshll.u32 %v1754_v25, 16  ;;  %v429_v49 = vshll.u32 %v401_v31, 16  ;;  %v973_v51 = vor.u32 %v972_v30, %v969_v29  ;;  %v426_v52 = vor.u32 %v425_v33, %v422_v32 }
  0x30   : > { %v443_v53 = vshll.u32 %v403_v42, 16  ;;  %v937_v56 = vsel %vm2234_vm3, %v932_v39, %v2283_v23  ;;  %v964_v57 = vrot.slane %v962_v40, 5  ;;  %v462_v61 = vshrl.u32 %v406_v5, 16  ;;  %v407_v40 = vld [vmem:[%s2180_s27 + $0x34] sm:$0x1] }
  0x31   : > { %v465_v62 = vshll.u32 %v406_v5, 16  ;;  %v951_v1 = vsel %vm2234_vm3, %v946_v3, %v950_v45  ;;  %v960_v18 = vrot.slane %v959_v48, 4  ;;  %v978_v19 = vrot.slane %v976_v37, 5  ;;  %v2328_v45 = vld [vmem:[%s2466_s1 + $0x1c] sm:$0xf] }
  0x32   : > { %v431_v20 = vrot.slane %v429_v49, 5  ;;  %v974_v21 = vrot.slane %v973_v51, 4  ;;  %v427_v23 = vrot.slane %v426_v52, 4  ;;  %v445_v24 = vrot.slane %v443_v53, 5  ;;  %v409_v53 = vld [vmem:[%s2180_s27 + $0x44] sm:$0x1] }
  0x33   : > { %v476_v27 = vshrl.u32 %v408_v58, 16  ;;  %v490_v29 = vshrl.u32 %v410_v0, 16  ;;  %v493_v30 = vshll.u32 %v410_v0, 16  ;;  %v464_v32 = vrot.slane %v462_v61, 4 }
  0x34   : > { %v467_v33 = vrot.slane %v465_v62, 5  ;;  %v1758_v39 = vcombine.low %v937_v56, %v951_v1  ;;  %v965_v42 = vsel %vm2234_vm3, %v960_v18, %v964_v57  ;;  %v471_v52 = vshll.u32 %v407_v40, 16 }
  0x35   : > { %v478_v3 = vrot.slane %v476_v27, 4  ;;  %v492_v37 = vrot.slane %v490_v29, 4  ;;  %v495_v49 = vrot.slane %v493_v30, 5 }
  0x36   : > { %v468_v51 = vor.u32 %v467_v33, %v464_v32 }
  0x37   : > { %v496_v61 = vor.u32 %v495_v49, %v492_v37 }
  0x38   : > { %v469_v18 = vrot.slane %v468_v51, 4 }
  0x85   : > { %v231_v54 = vpop.permute.xlu0 %230 }
  0x86   : > { %v233_v59 = vpop.permute.xlu1 %232  ;;  %1878 = vmatprep.mubr.msk.bf16.mxu1 %vm238_vm4, %v231_v54  ;;  %v448_v54 = vshrl.u32 %v404_v43, 16 }
  0x87   : > { %1879 = vmatmul.mubr.msk.bf16.vlgmr.msra.gmra.mrb[0].mxu1 %vm238_vm4, %v233_v59  ;;  %v440_v59 = vor.u32 %v439_v47, %v436_v46  ;;  %v414_v46 = vld [vmem:[%s2180_s27 + $0x70] sm:$0xf]  ;;  %v1725_v47 = vld [vmem:[%s2466_s1 + $0xc] sm:$0xf] }
  0x88   : > { %1887 = vmatpush3.bf16.msra.mxu1 %v333_v34  ;;  %v450_v25 = vrot.slane %v448_v54, 4  ;;  %v411_v54 = vld [vmem:[%s2180_s27 + $0x54] sm:$0x1]  ;;  %v518_v57 = vshrl.u32 %v414_v46, 16 }
  0x89   : > { %v757_v28 = vpop.permute.xlu0 %756  ;;  %2034 = vmatprep.subr.msk.bf16.mxu1 %vm251_vm0, %v2274_v63  ;;  %v441_v31 = vrot.slane %v440_v59, 4  ;;  %v499_v62 = vshll.u32 %v411_v54, 16  ;;  %v1787_v54 = vld [vmem:[%s2180_s27 + $0x14] sm:$0x1] }
  0x8a   : > { %v759_v34 = vpop.permute.xlu1 %758  ;;  %1918 = vmatprep.mubr.msk.bf16.mxu0 %vm238_vm4, %v757_v28  ;;  %v479_v28 = vshll.u32 %v408_v58, 16  ;;  %v521_v58 = vshll.u32 %v414_v46, 16 }
  0x8b   : > { %1919 = vmatmul.mubr.msk.bf16.vlgmr.msra.gmra.mrb[0].mxu0 %vm238_vm4, %v759_v34  ;;  %v1129_v34 = vsel %vm251_vm0, %v2281_v22, 0  ;;  %v446_v5 = vsel %vm2234_vm3, %v441_v31, %v445_v24  ;;  %v501_v29 = vrot.slane %v499_v62, 5 }
  0x8c   : > { %1927 = vmatpush3.bf16.msra.mxu0 %v1007_v36  ;;  %1928 = vmatprep.mubr.msk.bf16.mxu0 %vm238_vm4, %v1756_v60  ;;  %v1757_v36 = vcombine.low %v909_v38, %v923_v44  ;;  %v451_v60 = vshll.u32 %v404_v43, 16  ;;  %v558_v38 = vsel %vm251_vm0, %v2274_v63, 0  ;;  %v979_v43 = vsel %vm2234_vm3, %v974_v21, %v978_v19  ;;  %v412_v63 = vld [vmem:[%s2180_s27 + $0x60] sm:$0xf] }
  0x8d   : > { %v235_v50 = vpop.permute.xlu0 %234  ;;  %2039 = vmatprep.subr.msk.bf16.mxu0 %vm251_vm0, %v2281_v22  ;;  %v432_v44 = vsel %vm2234_vm3, %v427_v23, %v431_v20  ;;  %v457_v22 = vshll.u32 %v405_v26, 16  ;;  %v481_v48 = vrot.slane %v479_v28, 5  ;;  %v507_v56 = vshll.u32 %v412_v63, 16  ;;  %v413_v20 = vld [vmem:[%s2180_s27 + $0x64] sm:$0x1] }
  0x8e   : > { %v237_v55 = vpop.permute.xlu1 %236  ;;  %1882 = vmatprep.mubr.msk.bf16.mxu1 %vm238_vm4, %v235_v50  ;;  %v1709_v0 = vcombine.low %v432_v44, %v446_v5  ;;  %v473_v19 = vrot.slane %v471_v52, 5  ;;  %v520_v23 = vrot.slane %v518_v57, 4  ;;  %v523_v24 = vrot.slane %v521_v58, 5 }
  0x8f   : > { %1883 = vmatmul.mubr.msk.bf16.gmra.mrb[4].mxu1 %vm238_vm4, %v237_v55  ;;  %v504_v55 = vshrl.u32 %v412_v63, 16  ;;  %v482_v59 = vor.u32 %v481_v48, %v478_v3  ;;  %v509_v21 = vrot.slane %v507_v56, 5  ;;  %v497_v28 = vrot.slane %v496_v61, 4  ;;  %v1788_v3 = vld [vmem:[%s2180_s27 + $0x20] sm:$0xf] }
  0x90   : > { %1888 = vmatprep.mubr.msk.bf16.mxu1 %vm238_vm4, %v2183_v6  ;;  %v453_v6 = vrot.slane %v451_v60, 5  ;;  %v485_v60 = vshll.u32 %v409_v53, 16  ;;  %v513_v31 = vshll.u32 %v413_v20, 16  ;;  %v524_v33 = vor.u32 %v523_v24, %v520_v23  ;;  %v1802_v48 = vld [vmem:[%s2466_s1 + $0x20] sm:$0xf] }
  0x91   : > { %v483_v26 = vrot.slane %v482_v59, 4  ;;  %v679_v63 = vsel %vm251_vm0, %v1725_v47, 0  ;;  %v1333_v5 = vshrl.u32 %v1788_v3, 16  ;;  %v1790_v53 = vld [vmem:[%s2180_s27 + $0x30] sm:$0xf]  ;;  %v1207_v58 = vpop.permute.xlu0 %1206 }
  0x92   : > { %v454_v50 = vor.u32 %v453_v6, %v450_v25  ;;  %v415_v25 = vld [vmem:[%s2180_s27 + $0x74] sm:$0x1]  ;;  %v487_v27 = vrot.slane %v485_v60, 5  ;;  %v474_v6 = vsel %vm2234_vm3, %v469_v18, %v473_v19  ;;  %v1796_v59 = vld [vmem:[%s2180_s27 + $0x60] sm:$0xf]  ;;  %v1328_v60 = vshll.u32 %v1787_v54, 16 }
  0x93   : > { %v1335_v56 = vrot.slane %v1333_v5, 4  ;;  %v1347_v61 = vshrl.u32 %v1790_v53, 16 }
  0x94   : > { %v455_v1 = vrot.slane %v454_v50, 4  ;;  %v1330_v24 = vrot.slane %v1328_v60, 5 }
  0x97   : > { %1889 = vmatmul.mubr.msk.bf16.vlgmr.msra.gmra.mrb[0].mxu1 %vm238_vm4, %v2186_v7  ;;  %1929 = vmatmul.mubr.msk.bf16.vlgmr.msra.gmra.mrb[0].mxu0 %vm238_vm4, %v1757_v36  ;;  %v1759_v7 = vcombine.low %v965_v42, %v979_v43  ;;  %v459_v36 = vrot.slane %v457_v22, 5  ;;  %v515_v42 = vrot.slane %v513_v31, 5  ;;  %v525_v43 = vrot.slane %v524_v33, 4  ;;  %v1786_v22 = vld [vmem:[%s2180_s27 + $0x10] sm:$0xf] }
  0x98   : > { %1937 = vmatpush3.bf16.msra.mxu0 %v1129_v34  ;;  %1897 = vmatpush3.bf16.msra.mxu1 %v558_v38  ;;  %v527_v34 = vshll.u32 %v415_v25, 16  ;;  %v502_v38 = vsel %vm2234_vm3, %v497_v28, %v501_v29  ;;  %v1319_v37 = vshrl.u32 %v1786_v22, 16  ;;  %v1322_v49 = vshll.u32 %v1786_v22, 16  ;;  %v1791_v28 = vld [vmem:[%s2180_s27 + $0x34] sm:$0x1] }
  0x99   : > { %1892 = vmatprep.mubr.msk.bf16.mxu1 %vm238_vm4, %v2198_v10  ;;  %1932 = vmatprep.mubr.msk.bf16.mxu0 %vm238_vm4, %v1758_v39  ;;  %v506_v10 = vrot.slane %v504_v55, 4  ;;  %v460_v30 = vsel %vm2234_vm3, %v455_v1, %v459_v36  ;;  %v1789_v55 = vld [vmem:[%s2180_s27 + $0x24] sm:$0x1]  ;;  %v1794_v36 = vld [vmem:[%s2180_s27 + $0x50] sm:$0xf] }
  0x9a   : > { %2040 = vmatprep.subr.msk.bf16.mxu0 %vm251_vm0, %v2328_v45  ;;  %2035 = vmatprep.subr.msk.bf16.mxu1 %vm251_vm0, %v1725_v47  ;;  %v1710_v39 = vcombine.low %v460_v30, %v474_v6  ;;  %v529_v44 = vrot.slane %v527_v34, 5  ;;  %v1321_v51 = vrot.slane %v1319_v37, 4  ;;  %v1324_v52 = vrot.slane %v1322_v49, 5  ;;  %v1793_v6 = vld [vmem:[%s2180_s27 + $0x44] sm:$0x1] }
  0x9b   : > { %v510_v32 = vor.u32 %v509_v21, %v506_v10  ;;  %v1375_v19 = vshrl.u32 %v1794_v36, 16  ;;  %v1378_v20 = vshll.u32 %v1794_v36, 16  ;;  %v1389_v10 = vshrl.u32 %v1796_v59, 16 }
  0x9c   : > { %v530_v47 = vsel %vm2234_vm3, %v525_v43, %v529_v44  ;;  %v1392_v21 = vshll.u32 %v1796_v59, 16  ;;  %v1356_v43 = vshll.u32 %v1791_v28, 16 }
  0x9d   : > { %v511_v40 = vrot.slane %v510_v32, 4  ;;  %v1377_v32 = vrot.slane %v1375_v19, 4  ;;  %v1380_v33 = vrot.slane %v1378_v20, 5  ;;  %v1391_v34 = vrot.slane %v1389_v10, 4 }
  0x9e   : > { %v1358_v37 = vrot.slane %v1356_v43, 5 }
  0x9f   : > { %1893 = vmatmul.mubr.msk.bf16.gmra.mrb[4].mxu1 %vm238_vm4, %v2202_v11  ;;  %1933 = vmatmul.mubr.msk.bf16.gmra.mrb[4].mxu0 %vm238_vm4, %v1759_v7  ;;  %v488_v11 = vsel %vm2234_vm3, %v483_v26, %v487_v27  ;;  %v1792_v7 = vld [vmem:[%s2180_s27 + $0x40] sm:$0xf]  ;;  %v1209_v26 = vpop.permute.xlu1 %1208 }
  0xa0   : > { %1898 = vmatprep.mubr.msk.bf16.mxu1 %vm238_vm4, %v1709_v0  ;;  %1938 = vmatprep.mubr.msk.bf16.mxu0 %vm238_vm4, %v2206_v12  ;;  %v1227_v12 = vsel %vm251_vm0, %v2328_v45, 0  ;;  %v1711_v46 = vcombine.low %v488_v11, %v502_v38  ;;  %v516_v45 = vsel %vm2234_vm3, %v511_v40, %v515_v42  ;;  %v1350_v0 = vshll.u32 %v1790_v53, 16  ;;  %v1211_v38 = vpop.permute.xlu0 %1210  ;;  %v1797_v40 = vld [vmem:[%s2180_s27 + $0x64] sm:$0x1] }
  0xa1   : > { %v1712_v50 = vcombine.low %v516_v45, %v530_v47  ;;  %v1361_v1 = vshrl.u32 %v1792_v7, 16  ;;  %v1364_v18 = vshll.u32 %v1792_v7, 16  ;;  %v1394_v11 = vrot.slane %v1392_v21, 5 }
  0xa2   : > { %v1352_v29 = vrot.slane %v1350_v0, 5 }
  0xa3   : > { %v1363_v30 = vrot.slane %v1361_v1, 4  ;;  %v1366_v31 = vrot.slane %v1364_v18, 5  ;;  %v1213_v49 = vpop.permute.xlu1 %1212 }
  0xa7   : > { %1899 = vmatmul.mubr.msk.bf16.vlgmr.msra.gmra.mrb[0].mxu1 %vm238_vm4, %v1710_v39  ;;  %1939 = vmatmul.mubr.msk.bf16.vlgmr.msra.gmra.mrb[0].mxu0 %vm238_vm4, %v2210_v13  ;;  %v1336_v13 = vshll.u32 %v1788_v3, 16  ;;  %v1795_v39 = vld [vmem:[%s2180_s27 + $0x54] sm:$0x1]  ;;  %v1395_v3 = vor.u32 %v1394_v11, %v1391_v34 }
  0xa8   : > { %1947 = vmatpush3.bf16.msra.mxu0 %v1227_v12  ;;  %1907 = vmatpush3.bf16.msra.mxu1 %v679_v63  ;;  %v1367_v12 = vor.u32 %v1366_v31, %v1363_v30  ;;  %v1370_v63 = vshll.u32 %v1793_v6, 16 }
  0xa9   : > { %1902 = vmatprep.mubr.msk.bf16.mxu1 %vm238_vm4, %v1711_v46  ;;  %1942 = vmatprep.mubr.msk.bf16.mxu0 %vm238_vm4, %v2214_v14  ;;  %v1338_v57 = vrot.slane %v1336_v13, 5  ;;  %v1325_v14 = vor.u32 %v1324_v52, %v1321_v51  ;;  %v1384_v46 = vshll.u32 %v1795_v39, 16  ;;  %v761_v13 = vpop.permute.xlu0 %760  ;;  %v1396_v52 = vrot.slane %v1395_v3, 4 }
  0xaa   : > { %2041 = vmatprep.subr.msk.bf16.mxu0 %vm251_vm0, %v1802_v48  ;;  %2037 = vmatprep.subr.msk.bf16.mxu1 %vm251_vm0, %v2151_v2  ;;  %v1342_v2 = vshll.u32 %v1789_v55, 16  ;;  %v1372_v5 = vrot.slane %v1370_v63, 5 }
  0xab   : > { %v1339_v62 = vor.u32 %v1338_v57, %v1335_v56  ;;  %v1326_v23 = vrot.slane %v1325_v14, 4  ;;  %v1386_v51 = vrot.slane %v1384_v46, 5 }
  0xac   : > { %v1344_v25 = vrot.slane %v1342_v2, 5 }
  0xad   : > { %v1340_v27 = vrot.slane %v1339_v62, 4  ;;  %v1331_v42 = vsel %vm2234_vm3, %v1326_v23, %v1330_v24 }
  0xaf   : > { %1903 = vmatmul.mubr.msk.bf16.gmra.mrb[4].mxu1 %vm238_vm4, %v1712_v50  ;;  %1943 = vmatmul.mubr.msk.bf16.gmra.mrb[4].mxu0 %vm238_vm4, %v2218_v15  ;;  %v1457_v15 = vsel %vm251_vm0, %v1802_v48, 0  ;;  %v1345_v44 = vsel %vm2234_vm3, %v1340_v27, %v1344_v25  ;;  %v1398_v48 = vshll.u32 %v1797_v40, 16 }
  0xb0   : > { %1908 = vmatprep.mubr.msk.bf16.mxu1 %vm238_vm4, %v2190_v8  ;;  %1948 = vmatprep.mubr.msk.bf16.mxu0 %vm238_vm4, %v1207_v58  ;;  %v1349_v8 = vrot.slane %v1347_v61, 4  ;;  %v1803_v45 = vcombine.low %v1331_v42, %v1345_v44  ;;  %v763_v58 = vpop.permute.xlu1 %762 }
  0xb1   : > { %v1400_v53 = vrot.slane %v1398_v48, 5 }
  0xb2   : > { %v1353_v22 = vor.u32 %v1352_v29, %v1349_v8 }
  0xb3   : > { %v1401_v56 = vsel %vm2234_vm3, %v1396_v52, %v1400_v53 }
  0xb4   : > { %v1354_v47 = vrot.slane %v1353_v22, 4 }
  0xb7   : > { %1909 = vmatmul.mubr.msk.bf16.vlgmr.msra.gmra.mrb[0].mxu1 %vm238_vm4, %v2194_v9  ;;  %1949 = vmatmul.mubr.msk.bf16.vlgmr.msra.gmra.mrb[0].mxu0 %vm238_vm4, %v1209_v26  ;;  %v1381_v9 = vor.u32 %v1380_v33, %v1377_v32 }
  0xb8   : > { %1957 = vmatpush3.bf16.msra.mxu0 %v1457_v15  ;;  %1967 = vmatpush3.bf16.msra.mxu1 %v2164_v4  ;;  %v1368_v4 = vrot.slane %v1367_v12, 4 }
  0xb9   : > { %1912 = vmatprep.mubr.msk.bf16.mxu1 %vm238_vm4, %v2222_v16  ;;  %1952 = vmatprep.mubr.msk.bf16.mxu0 %vm238_vm4, %v1211_v38  ;;  %v1382_v50 = vrot.slane %v1381_v9, 4  ;;  %v1359_v16 = vsel %vm2234_vm3, %v1354_v47, %v1358_v37 }
  0xba   : > { %v1373_v54 = vsel %vm2234_vm3, %v1368_v4, %v1372_v5 }
  0xbb   : > { %v1387_v55 = vsel %vm2234_vm3, %v1382_v50, %v1386_v51  ;;  %v1804_v57 = vcombine.low %v1359_v16, %v1373_v54 }
  0xbf   : > { %1913 = vmatmul.mubr.msk.bf16.gmra.mrb[4].mxu1 %vm238_vm4, %v2226_v17  ;;  %1953 = vmatmul.mubr.msk.bf16.gmra.mrb[4].mxu0 %vm238_vm4, %v1213_v49  ;;  %v1805_v17 = vcombine.low %v1387_v55, %v1401_v56 }
  0xc0   : > { %1958 = vmatprep.mubr.msk.bf16.mxu0 %vm238_vm4, %v1803_v45  ;;  %1922 = vmatprep.mubr.msk.bf16.mxu1 %vm238_vm4, %v761_v13 }
  0xc7   : > { %1959 = vmatmul.mubr.msk.bf16.vlgmr.msra.gmra.mrb[0].mxu0 %vm238_vm4, %v1804_v57 }
  0xc8   : > { %1962 = vmatprep.mubr.msk.bf16.mxu0 %vm238_vm4, %v1805_v17 }
  0xcb   : > { %1923 = vmatmul.mubr.msk.bf16.vlgmr.msra.gmra.mrb[4].mxu1 %vm238_vm4, %v763_v58 }
  0xcf   : > { %1963 = vmatmul.mubr.msk.bf16.gmra.mrb[4].mxu0 %vm238_vm4, %v2242_v41 }
 0x18a   : > { %v1910_v7 = vpop.f32.mrb[0].mxu1 }
 0x18b   : > { %v715_v36 = vpop.f32.mrb[1].mxu1 }
 0x18c   : > { %v1911_v59 = vpop.f32.mrb[2].mxu1 }
 0x18d   : > { %v718_v14 = vpop.f32.mrb[3].mxu1 }
 0x19a   : > { %v1960_v60 = vpop.f32.mrb[0].mxu0 }
 0x19b   : > { %v1968_v2 = vadd.f32 %v1960_v60, %v1910_v7  ;;  %v1493_v61 = vpop.f32.mrb[1].mxu0 }
 0x19c   : > { %v1969_v62 = vadd.f32 %v1493_v61, %v715_v36  ;;  %v1961_v0 = vpop.f32.mrb[2].mxu0 }
 0x19d   : > { %v1541_v1 = vadd.f32 %v1968_v2, %v1811_v35  ;;  %v1970_v18 = vadd.f32 %v1961_v0, %v1911_v59  ;;  %v1496_v19 = vpop.f32.mrb[3].mxu0 }
 0x19e   : > { %v1539_v20 = vadd.f32 %v1969_v62, %v1811_v35  ;;  %v1971_v10 = vadd.f32 %v1496_v19, %v718_v14  ;;  %v1924_v41 = vpop.f32.mrb[4].mxu1 }
 0x19f   : > { %v1549_v21 = vmax.f32 %v1541_v1, 0.0  ;;  %v1542_v15 = vadd.f32 %v1970_v18, %v1811_v35  ;;  %v829_v23 = vpop.f32.mrb[5].mxu1 }
 0x1a0   : > { %v1547_v24 = vmax.f32 %v1539_v20, 0.0  ;;  %v1540_v25 = vadd.f32 %v1971_v10, %v1811_v35  ;;  %v1925_v8 = vpop.f32.mrb[6].mxu1 }
 0x1a1   : > { %v1825_v26 = vpack.c.bf16 %v1549_v21, %v1549_v21  ;;  %v1550_v27 = vmax.f32 %v1542_v15, 0.0  ;;  %v832_v28 = vpop.f32.mrb[7].mxu1 }
 0x1a2   : > { %v1823_v29 = vpack.c.bf16 %v1547_v24, %v1547_v24  ;;  %v1548_v30 = vmax.f32 %v1540_v25, 0.0  ;;  %v1964_v31 = vpop.f32.mrb[4].mxu0 }
 0x1a3   : > { %1590 = vst.msk [vmem:[%s2438_s21 + $0x8] sm:$0xf] %vm1587_vm5, %v1825_v26  ;;  %v1826_v6 = vpack.c.bf16 %v1550_v27, %v1550_v27  ;;  %v1972_v32 = vadd.f32 %v1964_v31, %v1924_v41  ;;  %v1509_v33 = vpop.f32.mrb[5].mxu0 }
 0x1a4   : > { %1588 = vst.msk [vmem:[%s2438_s21] sm:$0xf] %vm1587_vm5, %v1823_v29  ;;  %v1824_v34 = vpack.c.bf16 %v1548_v30, %v1548_v30  ;;  %v1973_v11 = vadd.f32 %v1509_v33, %v829_v23  ;;  %v1965_v38 = vpop.f32.mrb[6].mxu0 }
 0x1a5   : > { %1591 = vst.msk [vmem:[%s2438_s21 + $0xc] sm:$0xf] %vm1587_vm5, %v1826_v6  ;;  %v1545_v39 = vadd.f32 %v1972_v32, %v1811_v35  ;;  %v1974_v40 = vadd.f32 %v1965_v38, %v1925_v8  ;;  %v1512_v42 = vpop.f32.mrb[7].mxu0 }
 0x1a6   : > { %1589 = vst.msk [vmem:[%s2438_s21 + $0x4] sm:$0xf] %vm1587_vm5, %v1824_v34  ;;  %v1543_v43 = vadd.f32 %v1973_v11, %v1811_v35  ;;  %v1975_v44 = vadd.f32 %v1512_v42, %v832_v28 }
 0x1a7   : > { %v1553_v22 = vmax.f32 %v1545_v39, 0.0  ;;  %v1546_v12 = vadd.f32 %v1974_v40, %v1811_v35 }
 0x1a8   : > { %v1551_v63 = vmax.f32 %v1543_v43, 0.0  ;;  %v1544_v9 = vadd.f32 %v1975_v44, %v1811_v35 }
 0x1a9   : > { %v1829_v46 = vpack.c.bf16 %v1553_v22, %v1553_v22  ;;  %v1554_v3 = vmax.f32 %v1546_v12, 0.0 }
 0x1aa   : > { %v1827_v48 = vpack.c.bf16 %v1551_v63, %v1551_v63  ;;  %v1552_v37 = vmax.f32 %v1544_v9, 0.0 }
 0x1ab   : > { %1594 = vst.msk [vmem:[%s2438_s21 + $0x18] sm:$0xf] %vm1587_vm5, %v1829_v46  ;;  %v1830_v49 = vpack.c.bf16 %v1554_v3, %v1554_v3 }
 0x1ac   : > { %1592 = vst.msk [vmem:[%s2438_s21 + $0x10] sm:$0xf] %vm1587_vm5, %v1827_v48  ;;  %v1828_v45 = vpack.c.bf16 %v1552_v37, %v1552_v37 }
 0x1ad   : > { %1595 = vst.msk [vmem:[%s2438_s21 + $0x1c] sm:$0xf] %vm1587_vm5, %v1830_v49 }
 0x1ae   : > { %1593 = vst.msk [vmem:[%s2438_s21 + $0x14] sm:$0xf] %vm1587_vm5, %v1828_v45 }
 0x1af PF: > { %s13_s14 = sadd.s32 1, %s2102_s14   ;;  %s2471_s12 = smov %s2098_s13 }
 0x1b0   : > { %p10_p5 = scmp.ge.s32.totalorder %s13_s14, 4   ;;  %s2472_s13 = smov %s2474_s15 }
 0x1b2   :  { %12 = sbr.rel (!%p10_p5) target bundleno = 2 (0x2), region = 73 }

</bundles_post_ra>
